<compile_context>
chip_gen: v7x
topology: tpu7x:2x2x1
jax: 0.10.0
libtpu: 0.0.40
codegen_flags: <defaults>
</compile_context>

<pallas_src>
import jax
import jax.numpy as jnp
from jax import lax
from jax.experimental import pallas as pl
from jax.experimental.pallas import tpu as pltpu


def _bilinear_x2_matrix(n_in: int) -> jnp.ndarray:
    """Dense (2*n_in, n_in) matrix equal to F.interpolate(scale=2, bilinear,
    align_corners=False) along one axis (includes edge clamping)."""
    n_out = 2 * n_in
    i = jnp.arange(n_out, dtype=jnp.float32)
    src = (i + 0.5) / 2.0 - 0.5            # half-pixel source coordinate
    i0 = jnp.floor(src)
    frac = src - i0
    i0c = jnp.clip(i0, 0, n_in - 1).astype(jnp.int32)
    i1c = jnp.clip(i0 + 1, 0, n_in - 1).astype(jnp.int32)
    m = (jax.nn.one_hot(i0c, n_in, dtype=jnp.float32) * (1.0 - frac)[:, None]
         + jax.nn.one_hot(i1c, n_in, dtype=jnp.float32) * frac[:, None])
    return m


def _wf_kernel(x_ref, res_ref, w_ref, uh_ref, uwt_ref, o_ref):
    # x_ref:   (1, C, H, W)     low-res decoder feature (resident per batch)
    # res_ref: (1, Cin, TH, 2W) skip-feature row tile (streamed)
    # w_ref:   (C, Cin)         1x1 conv weight (no bias)
    # uh_ref:  (TH, H)          rows of the bilinear-x2 H matrix for this tile
    # uwt_ref: (W, 2W)          transposed bilinear-x2 W matrix
    # o_ref:   (1, C, TH, 2W)   output row tile
    f32 = jnp.float32

    # 1x1 conv, no bias (MXU): (C, Cin) x (Cin, TH, 2W) -> (C, TH, 2W), f32 acc.
    conv = lax.dot_general(w_ref[...], res_ref[0],
                           (((1,), (0,)), ((), ())),
                           preferred_element_type=f32)

    # H-direction upsample for this output row tile (MXU):
    #   (TH, H) x (C, H, W) -> (TH, C, W)
    a = lax.dot_general(uh_ref[...], x_ref[0],
                        (((1,), (1,)), ((), ())),
                        preferred_element_type=f32)
    # Re-order to channel-major.  This is the *pre*-W-upsample tensor, i.e.
    # half the size of the output tile.  Cast back to the compute dtype first
    # (halves the bytes moved, and keeps the next matmul on the fast MXU path).
    a = jnp.transpose(a, (1, 0, 2)).astype(x_ref.dtype)      # (C, TH, W)

    # W-direction upsample (MXU): (C, TH, W) x (W, 2W) -> (C, TH, 2W), f32 acc.
    up = lax.dot_general(a, uwt_ref[...],
                         (((2,), (0,)), ((), ())),
                         preferred_element_type=f32)

    # f32 add, single cast at the store (lane-dense along 2W).
    o_ref[0] = (conv + up).astype(o_ref.dtype)


def _pick_tile_rows(h2, c, cin, w2, h, w, in_bytes, out_bytes, budget_bytes):
    """Largest output-row tile TH (multiple of 8, dividing 2H) whose estimated
    VMEM footprint (double-buffered tiles + residents + f32 intermediates)
    fits the budget.  Bigger tiles amortize the ~0.35us per-grid-step cost."""
    cands = [d for d in range(8, h2 + 1, 8) if h2 % d == 0]
    if not cands or cands[-1] != h2:
        cands.append(h2)                      # full extent is always legal

    def vmem_estimate(th):
        tiles = 2 * th * w2 * (cin * in_bytes + c * out_bytes)        # res+out, x2 buffers
        resident = 2 * (c * h * w + th * h + w * w2 + c * cin) * in_bytes
        interm = 4 * c * th * w2 * 4                                  # f32 conv/up/a values
        return tiles + resident + interm

    best = cands[0]
    for th in cands:
        if vmem_estimate(th) <= budget_bytes:
            best = max(best, th)
    return best


def wf_forward(x_nchw, res_nchw, w_conv, *, tile_rows=None,
               compute_dtype=jnp.bfloat16, out_dtype=None,
               vmem_budget_bytes=20 * 1024 * 1024):
    """WF.forward.

    x_nchw:  (B, C, H, W)       decoder feature (decode_channels)
    res_nchw:(B, Cin, 2H, 2W)   skip feature (in_channels)
    w_conv:  (C, Cin, 1, 1)     pre_conv weight (PyTorch layout, no bias)
    Returns (B, C, 2H, 2W) in `out_dtype` (defaults to `compute_dtype`).
    """
    B, C, H, W = x_nchw.shape
    Br, Cin, H2, W2 = res_nchw.shape
    assert Br == B and H2 == 2 * H and W2 == 2 * W
    assert w_conv.shape == (C, Cin, 1, 1)
    if out_dtype is None:
        out_dtype = compute_dtype

    cbytes = jnp.dtype(compute_dtype).itemsize
    obytes = jnp.dtype(out_dtype).itemsize

    if tile_rows is None:
        tile_rows = _pick_tile_rows(H2, C, Cin, W2, H, W, cbytes, obytes,
                                    vmem_budget_bytes)
    TH = int(tile_rows)
    assert H2 % TH == 0 and (TH % 8 == 0 or TH == H2), (TH, H2)
    n_tiles = H2 // TH

    # No layout transposes of the big tensors: the kernel is NCHW-native.
    x = x_nchw.astype(compute_dtype)
    res = res_nchw.astype(compute_dtype)
    w = w_conv[:, :, 0, 0].astype(compute_dtype)              # (C, Cin)
    uh = _bilinear_x2_matrix(H).astype(compute_dtype)         # (2H, H)
    uwt = _bilinear_x2_matrix(W).T.astype(compute_dtype)      # (W, 2W)

    flops = 2 * B * (Cin * C * H2 * W2        # 1x1 conv
                     + C * H2 * W * H         # dense H-upsample
                     + C * H2 * W2 * W)       # dense W-upsample
    bytes_accessed = ((x.size + res.size + w.size + uh.size + uwt.size) * cbytes
                      + B * C * H2 * W2 * obytes)
    cost = pl.CostEstimate(flops=flops, transcendentals=0,
                           bytes_accessed=bytes_accessed)

    out = pl.pallas_call(
        _wf_kernel,
        out_shape=jax.ShapeDtypeStruct((B, C, H2, W2), out_dtype),
        grid_spec=pltpu.PrefetchScalarGridSpec(
            num_scalar_prefetch=0,
            grid=(B, n_tiles),
            in_specs=[
                # x, w, uwt are tile-invariant -> resident across the inner axis.
                pl.BlockSpec((1, C, H, W), lambda b, t: (b, 0, 0, 0)),
                pl.BlockSpec((1, Cin, TH, W2), lambda b, t: (b, 0, t, 0)),
                pl.BlockSpec((C, Cin), lambda b, t: (0, 0)),
                pl.BlockSpec((TH, H), lambda b, t: (t, 0)),
                pl.BlockSpec((W, W2), lambda b, t: (0, 0)),
            ],
            out_specs=pl.BlockSpec((1, C, TH, W2), lambda b, t: (b, 0, t, 0)),
        ),
        compiler_params=pltpu.CompilerParams(
            dimension_semantics=("parallel", "parallel"),
            vmem_limit_bytes=32 * 1024 * 1024),
        cost_estimate=cost,
    )(x, res, w, uh, uwt)
    return out


def _wf_reference(x_nchw, res_nchw, w_conv):
    """Pure-JAX f32 reference of WF.forward (NCHW in/out)."""
    uh = _bilinear_x2_matrix(x_nchw.shape[2])
    uw = _bilinear_x2_matrix(x_nchw.shape[3])
    up = jnp.einsum('Hh,Ww,bchw->bcHW', uh, uw, x_nchw.astype(jnp.float32))
    conv = jnp.einsum('bihw,oi->bohw', res_nchw.astype(jnp.float32),
                      w_conv[:, :, 0, 0].astype(jnp.float32))
    return conv + up


if __name__ == "__main__":
    key = jax.random.PRNGKey(0)

    # ---- Test 1/2: tiny shapes consistent with WF (in_channels=8, decode=16),
    # tile_rows=8 forces a 2-tile row split so the pipelined path is exercised.
    B, Cin, Cdec, H, W = 2, 8, 16, 8, 8
    kx, kres, kw, k2 = jax.random.split(key, 4)
    x = jax.random.normal(kx, (B, Cdec, H, W), dtype=jnp.float32)
    res = jax.random.normal(kres, (B, Cin, 2 * H, 2 * W), dtype=jnp.float32)
    w_conv = 0.1 * jax.random.normal(kw, (Cdec, Cin, 1, 1), dtype=jnp.float32)

    ref = _wf_reference(x, res, w_conv)

    # 1) f32 I/O run: exact check.
    out_f32 = wf_forward(x, res, w_conv, tile_rows=8,
                         compute_dtype=jnp.float32, out_dtype=jnp.float32)
    out_f32 = jax.block_until_ready(out_f32)
    assert out_f32.shape == (B, Cdec, 2 * H, 2 * W)
    assert jnp.allclose(out_f32, ref, atol=1e-4, rtol=1e-4)

    # 2) Default perf configuration: bf16 I/O, f32 accumulation.  Compare
    #    against the reference evaluated on bf16-rounded inputs.
    out_bf16 = wf_forward(x, res, w_conv, tile_rows=8)
    out_bf16 = jax.block_until_ready(out_bf16)
    xq = x.astype(jnp.bfloat16).astype(jnp.float32)
    resq = res.astype(jnp.bfloat16).astype(jnp.float32)
    wq = w_conv.astype(jnp.bfloat16).astype(jnp.float32)
    refq = _wf_reference(xq, resq, wq)
    assert jnp.allclose(out_bf16.astype(jnp.float32), refq, atol=3e-2, rtol=3e-2)

    # ---- Test 3: moderate shape exercising the lane-dense (2W=128) path and
    # automatic tile-row selection.
    B2, Cin2, Cdec2, H2_, W2_ = 1, 16, 32, 64, 64
    x2 = jax.random.normal(jax.random.fold_in(k2, 0),
                           (B2, Cdec2, H2_, W2_), dtype=jnp.float32)
    res2 = jax.random.normal(jax.random.fold_in(k2, 1),
                             (B2, Cin2, 2 * H2_, 2 * W2_), dtype=jnp.float32)
    w2 = 0.1 * jax.random.normal(jax.random.fold_in(k2, 2),
                                 (Cdec2, Cin2, 1, 1), dtype=jnp.float32)
    out2 = wf_forward(x2, res2, w2)                 # default: bf16, auto tiles
    out2 = jax.block_until_ready(out2)
    assert out2.shape == (B2, Cdec2, 2 * H2_, 2 * W2_)
    ref2 = _wf_reference(x2.astype(jnp.bfloat16).astype(jnp.float32),
                         res2.astype(jnp.bfloat16).astype(jnp.float32),
                         w2.astype(jnp.bfloat16).astype(jnp.float32))
    assert jnp.allclose(out2.astype(jnp.float32), ref2, atol=3e-2, rtol=3e-2)

    print("KERNEL_OK")
</pallas_src>

<mosaic_0001>
module attributes {stable_mosaic.version = 11 : i64} {
  func.func @_wf_kernel(%arg0: i32, %arg1: i32, %arg2: memref<1x16x8x8xf32, #tpu.memory_space<vmem>>, %arg3: memref<1x8x8x16xf32, #tpu.memory_space<vmem>>, %arg4: memref<16x8xf32, #tpu.memory_space<vmem>>, %arg5: memref<8x8xf32, #tpu.memory_space<vmem>>, %arg6: memref<8x16xf32, #tpu.memory_space<vmem>>, %arg7: memref<1x16x8x16xf32, #tpu.memory_space<vmem>>) attributes {dimension_semantics = [#tpu.dimension_semantics<parallel>, #tpu.dimension_semantics<parallel>], iteration_bounds = array<i64: 2, 2>, scalar_prefetch = 0 : i64, scratch_operands = 0 : i64, tpu.core_type = #tpu.core_type<tc>, window_params = [{transform_indices = @transform_0, window_bounds = array<i64: 1, 16, 8, 8>}, {transform_indices = @transform_1, window_bounds = array<i64: 1, 8, 8, 16>}, {pipeline_mode = #tpu.pipeline_mode<synchronous>, transform_indices = @transform_2, window_bounds = array<i64: 16, 8>}, {transform_indices = @transform_3, window_bounds = array<i64: 8, 8>}, {pipeline_mode = #tpu.pipeline_mode<synchronous>, transform_indices = @transform_4, window_bounds = array<i64: 8, 16>}, {transform_indices = @transform_5, window_bounds = array<i64: 1, 16, 8, 16>}]} {
    %c0 = arith.constant 0 : index
    %c0_0 = arith.constant 0 : index
    %0 = vector.load %arg4[%c0, %c0_0] : memref<16x8xf32, #tpu.memory_space<vmem>>, vector<16x8xf32>
    %c0_1 = arith.constant 0 : index
    %c0_2 = arith.constant 0 : index
    %c0_3 = arith.constant 0 : index
    %c0_4 = arith.constant 0 : index
    %1 = vector.load %arg3[%c0_1, %c0_2, %c0_3, %c0_4] : memref<1x8x8x16xf32, #tpu.memory_space<vmem>>, vector<1x8x8x16xf32>
    %2 = vector.shape_cast %1 : vector<1x8x8x16xf32> to vector<8x8x16xf32>
    %cst = arith.constant dense<0.000000e+00> : vector<16x8x16xf32>
    %3 = tpu.matmul %0, %2, %cst {dimension_numbers = #tpu.dot_dimension_numbers<[1], [0], [0], [1, 2], [0, 0, 1, 1, 1, 2], [], []>} : vector<16x8xf32>, vector<8x8x16xf32>, vector<16x8x16xf32> -> vector<16x8x16xf32>
    %c0_5 = arith.constant 0 : index
    %c0_6 = arith.constant 0 : index
    %4 = vector.load %arg5[%c0_5, %c0_6] : memref<8x8xf32, #tpu.memory_space<vmem>>, vector<8x8xf32>
    %c0_7 = arith.constant 0 : index
    %c0_8 = arith.constant 0 : index
    %c0_9 = arith.constant 0 : index
    %c0_10 = arith.constant 0 : index
    %5 = vector.load %arg2[%c0_7, %c0_8, %c0_9, %c0_10] : memref<1x16x8x8xf32, #tpu.memory_space<vmem>>, vector<1x16x8x8xf32>
    %6 = vector.shape_cast %5 : vector<1x16x8x8xf32> to vector<16x8x8xf32>
    %cst_11 = arith.constant dense<0.000000e+00> : vector<8x16x8xf32>
    %7 = tpu.matmul %4, %6, %cst_11 {dimension_numbers = #tpu.dot_dimension_numbers<[1], [1], [0], [0, 2], [0, 0, 1, 0, 1, 2], [], []>} : vector<8x8xf32>, vector<16x8x8xf32>, vector<8x16x8xf32> -> vector<8x16x8xf32>
    %8 = tpu.transpose %7, [1, 0, 2] : vector<8x16x8xf32> -> vector<16x8x8xf32>
    %c0_12 = arith.constant 0 : index
    %c0_13 = arith.constant 0 : index
    %9 = vector.load %arg6[%c0_12, %c0_13] : memref<8x16xf32, #tpu.memory_space<vmem>>, vector<8x16xf32>
    %cst_14 = arith.constant dense<0.000000e+00> : vector<16x8x16xf32>
    %10 = tpu.matmul %8, %9, %cst_14 {dimension_numbers = #tpu.dot_dimension_numbers<[2], [0], [0, 1], [1], [0, 0, 0, 1, 1, 1], [], []>} : vector<16x8x8xf32>, vector<8x16xf32>, vector<16x8x16xf32> -> vector<16x8x16xf32>
    %11 = arith.addf %3, %10 : vector<16x8x16xf32>
    %c0_15 = arith.constant 0 : index
    %c0_16 = arith.constant 0 : index
    %c0_17 = arith.constant 0 : index
    %c0_18 = arith.constant 0 : index
    %12 = vector.load %arg7[%c0_15, %c0_16, %c0_17, %c0_18] : memref<1x16x8x16xf32, #tpu.memory_space<vmem>>, vector<1x16x8x16xf32>
    %13 = vector.shape_cast %12 : vector<1x16x8x16xf32> to vector<16x8x16xf32>
    %14 = vector.shape_cast %11 : vector<16x8x16xf32> to vector<1x16x8x16xf32>
    tpu.vector_store %arg7[%c0_15, %c0_16, %c0_17, %c0_18], %14 {strides = array<i32>} : memref<1x16x8x16xf32, #tpu.memory_space<vmem>>, vector<1x16x8x16xf32>,
    return
  }
  func.func @transform_0(%arg0: i32, %arg1: i32) -> (i32, i32, i32, i32) {
    %c0_i32 = arith.constant 0 : i32
    %c0_i32_0 = arith.constant 0 : i32
    %c0_i32_1 = arith.constant 0 : i32
    %c0_i32_2 = arith.constant 0 : i32
    return %arg0, %c0_i32, %c0_i32_0, %c0_i32_1 : i32, i32, i32, i32
  }
  func.func @transform_1(%arg0: i32, %arg1: i32) -> (i32, i32, i32, i32) {
    %c0_i32 = arith.constant 0 : i32
    %c0_i32_0 = arith.constant 0 : i32
    %c0_i32_1 = arith.constant 0 : i32
    return %arg0, %c0_i32, %arg1, %c0_i32_0 : i32, i32, i32, i32
  }
  func.func @transform_2(%arg0: i32, %arg1: i32) -> (i32, i32) {
    %c0_i32 = arith.constant 0 : i32
    %c0_i32_0 = arith.constant 0 : i32
    %c0_i32_1 = arith.constant 0 : i32
    return %c0_i32, %c0_i32_0 : i32, i32
  }
  func.func @transform_3(%arg0: i32, %arg1: i32) -> (i32, i32) {
    %c0_i32 = arith.constant 0 : i32
    %c0_i32_0 = arith.constant 0 : i32
    return %arg1, %c0_i32 : i32, i32
  }
  func.func @transform_4(%arg0: i32, %arg1: i32) -> (i32, i32) {
    %c0_i32 = arith.constant 0 : i32
    %c0_i32_0 = arith.constant 0 : i32
    %c0_i32_1 = arith.constant 0 : i32
    return %c0_i32, %c0_i32_0 : i32, i32
  }
  func.func @transform_5(%arg0: i32, %arg1: i32) -> (i32, i32, i32, i32) {
    %c0_i32 = arith.constant 0 : i32
    %c0_i32_0 = arith.constant 0 : i32
    %c0_i32_1 = arith.constant 0 : i32
    return %arg0, %c0_i32, %arg1, %c0_i32_0 : i32, i32, i32, i32
  }
}

</mosaic_0001>

<bundles_post_ra>
// kernel: tpu_custom_call.1
= control target key start
LH: loop header
LB: loop body
LE: loop exit
PB: predicated region body
PF: predicated region fallthrough
CT: control target
= control target key end

     0   :  { %10 = vsyncpa [#allocation4], 0  ;;  %s4142_s0 = inlined_call_operand.vmem [shape: f32[2,16,8,8], index: 0, kind: input, shape index: {}]   ;;  %s4143_s1 = inlined_call_operand.vmem [shape: f32[2,8,16,16], index: 1, kind: input, shape index: {}]   ;;  %s4144_s2 = inlined_call_operand.vmem [shape: f32[16,8], index: 2, kind: input, shape index: {}]   ;;  %s4145_s3 = inlined_call_operand.vmem [shape: f32[16,8], index: 3, kind: input, shape index: {}]   ;;  %s4146_s4 = inlined_call_operand.vmem [shape: f32[8,16], index: 4, kind: input, shape index: {}]   ;;  %s4147_s5 = inlined_call_operand.hbm [shape: f32[2,16,16,16], index: 5, kind: output, shape index: {}]  }
   0x1   :  { %12 = vsyncpa [#allocation4 + $0x1], 0  ;;  %s3436_s18 = smov 0   ;;  %s3438_s19 = smov 0  }
   0x2   :  { %s3440_s20 = smov 0   ;;  %s3442_s21 = smov 0  }
   0x3   :  { %s3444_s22 = smov 0   ;;  %s3446_s23 = smov 0  }
   0x4   :  { %s3448_s24 = smov 0   ;;  %s3450_s25 = smov 0  }
   0x5 LB: > { %s3030_s26 = sadd.s32 4294967295, %s3382_s25   ;;  %s3031_s27 = sadd.s32 4294967294, %s3382_s25   ;;  %s3382_s25 = sphi %s3450_s25, %s18_s25   ;;  %s3378_s24 = sphi %s3448_s24, %s4190_s24   ;;  %s3374_s23 = sphi %s3446_s23, %s4189_s23   ;;  %s3370_s22 = sphi %s3444_s22, %s4188_s22   ;;  %s3366_s21 = sphi %s3442_s21, %s4187_s21   ;;  %s3362_s20 = sphi %s3440_s20, %s4186_s20   ;;  %s3358_s19 = sphi %s3438_s19, %s4185_s19   ;;  %s3354_s18 = sphi %s3436_s18, %s4184_s18  }
   0x6   : > { %s27_s28 = sadd.s32 1, %s3374_s23  ;;  %s30_s29 = sadd.s32 1, %s3378_s24 }
   0x7   : > { %p28_p0 = scmp.ge.s32.totalorder %s27_s28, 2  ;;  %p72_p1 = scmp.ne.s32.totalorder %s3362_s20, %s3358_s19 }
   0x8   : > { %p73_p2 = scmp.eq.s32.totalorder %s3382_s25, 0  ;;  %p172_p5 = scmp.eq.s32.totalorder %s3030_s26, 3 }
   0x9   : > { %s4192_s28 = smov (%p28_p0, %s27_s28), 0  ;;  %s4194_s29 = smov (!%p28_p0, %s30_s29), %s3378_s24 }
   0xa   : > { %s61_s30 = ssub.s32 %s3374_s23, %s4192_s28  ;;  %p3488_p3 = por %p73_p2, %p72_p1 }
   0xb   : > { %p32_p4 = scmp.ge.s32.totalorder %s4194_s29, 2  ;;  %p177_p6 = scmp.ne.s32.totalorder %s3358_s19, %s3354_s18 }
   0xc   : > { %p178_p7 = scmp.eq.s32.totalorder %s3031_s27, 3  ;;  %p3496_p8 = por %p172_p5, %p72_p1 }
   0xd   : > { %s4196_s29 = smov (%p32_p4, %s4194_s29), 0  ;;  %s65_s11 = sadd.s32 1, %s3362_s20 }
   0xe   : > { %p3500_p9 = por %p178_p7, %p177_p6  ;;  %s60_s9 = ssub.s32 %s3378_s24, %s4196_s29 }
   0xf   : > { %s62_s10 = sor.u32 %s61_s30, %s60_s9  ;;  %p3033_p11 = scmp.ge.s32.totalorder %s3382_s25, 4 }
  0x10   : > { %p63_p10 = scmp.eq.s32.totalorder %s62_s10, 0 }
  0x11   : > { %200 = sbr.rel (%p3033_p11) target bundleno = 34 (0x22), region = 24 }
  0x12   : > { %s3508_s12 = scalar_select %p63_p10, %s3362_s20, %s65_s11  }
  0x18   : > { %211 = sbr.rel (!%p3488_p3) target bundleno = 34 (0x22), region = 32  ;;  %s213_s13 = sand.u32 (%p3488_p3), 1, %s3362_s20  }
  0x19   : > { %s3035_s14 = sshll.u32 (%p3488_p3), %s3378_s24, 4  ;;  %s3034_s15 = sshll.u32 (%p3488_p3), %s213_s13, 6 }
  0x1a   : > { %s217_s16 = sadd.s32 (%p3488_p3), %s3374_s23, %s3035_s14  ;;  %s215_s9 = scalar_lea.vmem (%p3488_p3), [#allocation2], %s3034_s15 }
  0x1b   : > { %s3036_s17 = sshll.u32 (%p3488_p3), %s217_s16, 3 }
  0x1c   : > { %s219_s30 = scalar_lea.vmem (%p3488_p3), %s4143_s1, %s3036_s17 }
  0x1d   : > { %v261_v0 = vld [vmem:[%s219_s30] sm:$0xff] (%p3488_p3)  ;;  %v263_v1 = vld [vmem:[%s219_s30 + $0x10] sm:$0xff] (%p3488_p3) }
  0x1e   : > { %v265_v2 = vld [vmem:[%s219_s30 + $0x20] sm:$0xff] (%p3488_p3)  ;;  %262 = vst [vmem:[%s215_s9] sm:$0xff] (%p3488_p3), %v261_v0  ;;  %264 = vst [vmem:[%s215_s9 + $0x8] sm:$0xff] (%p3488_p3), %v263_v1  ;;  %v267_v3 = vld [vmem:[%s219_s30 + $0x30] sm:$0xff] (%p3488_p3) }
  0x1f   : > { %266 = vst [vmem:[%s215_s9 + $0x10] sm:$0xff] %v265_v2  ;;  %v269_v4 = vld [vmem:[%s219_s30 + $0x40] sm:$0xff]  ;;  %v271_v5 = vld [vmem:[%s219_s30 + $0x50] sm:$0xff]  ;;  %268 = vst [vmem:[%s215_s9 + $0x18] sm:$0xff] %v267_v3 }
  0x20   : > { %270 = vst [vmem:[%s215_s9 + $0x20] sm:$0xff] %v269_v4  ;;  %272 = vst [vmem:[%s215_s9 + $0x28] sm:$0xff] %v271_v5  ;;  %v273_v6 = vld [vmem:[%s219_s30 + $0x60] sm:$0xff]  ;;  %v275_v7 = vld [vmem:[%s219_s30 + $0x70] sm:$0xff] }
  0x21   : > { %274 = vst [vmem:[%s215_s9 + $0x30] sm:$0xff] %v273_v6  ;;  %276 = vst [vmem:[%s215_s9 + $0x38] sm:$0xff] %v275_v7 }
  0x22 PF: > { %p3037_p12 = scmp.ge.s32.totalorder %s3382_s25, 1  ;;  %p288_p13 = scmp.lt.s32.totalorder %s3382_s25, 5 }
  0x24   : > { %p289_p0 = pnand %p3037_p12, %p288_p13 }
  0x25   : > { %p331_p1 = scmp.lt.s32.totalorder (!%p289_p0), %s3370_s22, 1  ;;  %v372_v8 = vlaneseq (!%p289_p0)  ;;  %v3384_v9 = vmov (!%p289_p0), 1983009808   ;;  %v3385_v12 = vmov (!%p289_p0), 1934713408   ;;  %s4154_s15 = smov (!%p289_p0), 8  }
  0x26   : > { %292 = sbr.rel (%p289_p0) target bundleno = 1129 (0x469), region = 74  ;;  %v370_v10 = vunpack.c.l.s4 (!%p289_p0), %v3384_v9  ;;  %v434_v13 = vunpack.c.l.s4 (!%p289_p0), %v3385_v12  ;;  %s4158_s16 = smov (!%p289_p0), 24   ;;  %vm3396_vm0 = vmmov (!%p289_p0), 0   ;;  %vm971_vm1 = vcmask (!%p289_p0), 64512  }
  0x27   : > { %v373_v11 = vshrl.u32 (!%p289_p0), %v372_v8, 7  ;;  %s4156_s17 = smov (!%p289_p0), 16   ;;  %s4160_s26 = smov (!%p289_p0), 32   ;;  %vm973_vm2 = vcmask (!%p289_p0), 130048   ;;  %vm975_vm3 = vcmask (!%p289_p0), 195584   ;;  %vm977_vm4 = vcmask (!%p289_p0), 261120  }
  0x28   : > { %v371_v14 = vunpack.c.0.s8 (!%p289_p0), %v370_v10  ;;  %v435_v16 = vunpack.c.0.s8 (!%p289_p0), %v434_v13  ;;  %s3390_s27 = smov (!%p289_p0), 40   ;;  %s4165_s30 = smov (!%p289_p0), 48   ;;  %vm979_vm5 = vcmask (!%p289_p0), 326656   ;;  %vm981_vm6 = vcmask (!%p289_p0), 392192  }
  0x29   : > { %s3392_s9 = smov (!%p289_p0), 56   ;;  %s4152_s11 = smov (!%p289_p0), 80   ;;  %vm983_vm7 = vcmask (!%p289_p0), 457728   ;;  %vm985_vm8 = vcmask (!%p289_p0), 523264   ;;  %vm987_vm9 = vcmask (!%p289_p0), 588800   ;;  %vm989_vm10 = vcmask (!%p289_p0), 654336  }
  0x2a   : > { %v3528_v15 = vsub.s32 (!%p289_p0), %v371_v14, %v373_v11  ;;  %v3538_v25 = vsub.s32 (!%p289_p0), %v435_v16, %v373_v11  ;;  %s4150_s13 = smov (!%p289_p0), 88   ;;  %p336_p2 = scmp.lt.s32.totalorder (!%p289_p0), %s3366_s21, 1  ;;  %vm991_vm11 = vcmask (!%p289_p0), 719872   ;;  %vm993_vm12 = vcmask (!%p289_p0), 785408  }
  0x2b   : > { %vm995_vm13 = vcmask (!%p289_p0), 850944   ;;  %vm997_vm14 = vcmask (!%p289_p0), 916480   ;;  %vm999_vm15 = vcmask (!%p289_p0), 982016  }
  0x2d   : > { %s332_s6 = scalar_select %p331_p1, %s3370_s22, 1 }
  0x2f   : > { %s3099_s10 = sshll.u32 %s332_s6, 7  ;;  %s3393_s6 = smov 64  }
  0x30   : > { %s3526_s14 = scalar_lea.vmem %s4142_s0, %s3099_s10  ;;  %s4148_s10 = smov 72  }
  0x31   : > { %v3252_v17 = vld [vmem:[%s3526_s14] ss:$16 sps:$4 sm:$0xff]   ;;  %v3254_v18 = vld [vmem:[%s3526_s14 + $0x4] ss:$16 sps:$4 sm:$0xff]   ;;  %v3255_v19 = vld [vmem:[%s3526_s14 + $0x8] ss:$16 sps:$4 sm:$0xff]  }
  0x32   : > { %v3257_v20 = vld [vmem:[%s3526_s14 + $0xc] ss:$16 sps:$4 sm:$0xff]   ;;  %v375_v21 = vrot.slane %v3252_v17, %v3528_v15  ;;  %v382_v22 = vrot.slane %v3254_v18, %v3528_v15  ;;  %v391_v23 = vrot.slane %v3255_v19, %v3528_v15  ;;  %v3258_v26 = vld [vmem:[%s3526_s14 + $0x20] ss:$16 sps:$4 sm:$0xff]   ;;  %v3260_v27 = vld [vmem:[%s3526_s14 + $0x24] ss:$16 sps:$4 sm:$0xff]  }
  0x33   : > { %v398_v24 = vrot.slane %v3257_v20, %v3528_v15  ;;  %v3261_v28 = vld [vmem:[%s3526_s14 + $0x28] ss:$16 sps:$4 sm:$0xff]   ;;  %v3263_v29 = vld [vmem:[%s3526_s14 + $0x2c] ss:$16 sps:$4 sm:$0xff]   ;;  %v407_v34 = vrot.slane %v3258_v26, %v3528_v15  ;;  %v414_v35 = vrot.slane %v3260_v27, %v3528_v15  ;;  %v3264_v10 = vld [vmem:[%s3526_s14 + $0x40] ss:$16 sps:$4 sm:$0xff]  }
  0x34   : > { %v431_v30 = vcombine.low %v375_v21, %v391_v23  ;;  %v432_v31 = vcombine.high %v375_v21, %v391_v23  ;;  %v423_v36 = vrot.slane %v3261_v28, %v3528_v15  ;;  %v430_v37 = vrot.slane %v3263_v29, %v3528_v15  ;;  %v3266_v11 = vld [vmem:[%s3526_s14 + $0x44] ss:$16 sps:$4 sm:$0xff]   ;;  %v3267_v12 = vld [vmem:[%s3526_s14 + $0x48] ss:$16 sps:$4 sm:$0xff]   ;;  %v3270_v23 = vld [vmem:[%s3526_s14 + $0x60] ss:$16 sps:$4 sm:$0xff]  }
  0x35   : > { %v447_v32 = vcombine.low %v382_v22, %v398_v24  ;;  %v448_v33 = vcombine.high %v382_v22, %v398_v24  ;;  %v3269_v22 = vld [vmem:[%s3526_s14 + $0x4c] ss:$16 sps:$4 sm:$0xff]   ;;  %v3272_v29 = vld [vmem:[%s3526_s14 + $0x64] ss:$16 sps:$4 sm:$0xff]  }
  0x36   : > { %v439_v38 = vrot.slane %v431_v30, %v3538_v25  ;;  %v446_v39 = vrot.slane %v432_v31, %v3538_v25  ;;  %v463_v42 = vcombine.low %v407_v34, %v423_v36  ;;  %v464_v43 = vcombine.high %v407_v34, %v423_v36  ;;  %v3273_v30 = vld [vmem:[%s3526_s14 + $0x68] ss:$16 sps:$4 sm:$0xff]   ;;  %v3275_v31 = vld [vmem:[%s3526_s14 + $0x6c] ss:$16 sps:$4 sm:$0xff]   ;;  %s4167_s14 = smov 96  }
  0x37   : > { %v455_v40 = vrot.slane %v447_v32, %v3538_v25  ;;  %v462_v41 = vrot.slane %v448_v33, %v3538_v25  ;;  %v479_v44 = vcombine.low %v414_v35, %v430_v37  ;;  %v480_v45 = vcombine.high %v414_v35, %v430_v37 }
  0x38   : > { %v3043_v46 = vcombine.low %v439_v38, %v446_v39  ;;  %v3045_v47 = vcombine.high %v439_v38, %v446_v39  ;;  %v471_v50 = vrot.slane %v463_v42, %v3538_v25  ;;  %v478_v51 = vrot.slane %v464_v43, %v3538_v25 }
  0x39   : > { %v3047_v48 = vcombine.low %v455_v40, %v462_v41  ;;  %v3049_v49 = vcombine.high %v455_v40, %v462_v41  ;;  %v487_v52 = vrot.slane %v479_v44, %v3538_v25  ;;  %v494_v53 = vrot.slane %v480_v45, %v3538_v25 }
  0x3a   : > { %v647_v54 = vrot.slane %v3043_v46, %v3528_v15  ;;  %v663_v55 = vrot.slane %v3045_v47, %v3528_v15  ;;  %v3044_v58 = vcombine.low %v471_v50, %v478_v51  ;;  %v3046_v59 = vcombine.high %v471_v50, %v478_v51 }
  0x3b   : > { %v679_v56 = vrot.slane %v3047_v48, %v3528_v15  ;;  %v695_v57 = vrot.slane %v3049_v49, %v3528_v15  ;;  %v3048_v60 = vcombine.low %v487_v52, %v494_v53  ;;  %v3050_v61 = vcombine.high %v487_v52, %v494_v53 }
  0x3c   : > { %v703_v62 = vcombine.low %v647_v54, %v663_v55  ;;  %v704_v0 = vcombine.high %v647_v54, %v663_v55  ;;  %v654_v2 = vrot.slane %v3044_v58, %v3528_v15  ;;  %v670_v3 = vrot.slane %v3046_v59, %v3528_v15 }
  0x3d   : > { %v735_v63 = vcombine.low %v679_v56, %v695_v57  ;;  %v736_v1 = vcombine.high %v679_v56, %v695_v57  ;;  %v686_v4 = vrot.slane %v3048_v60, %v3528_v15  ;;  %v702_v5 = vrot.slane %v3050_v61, %v3528_v15 }
  0x3e   : > { %v3565_v6 = vrot.slane %v703_v62, %v3538_v25  ;;  %v718_v8 = vrot.slane %v704_v0, %v3538_v25  ;;  %v719_v13 = vcombine.low %v654_v2, %v670_v3  ;;  %v720_v16 = vcombine.high %v654_v2, %v670_v3 }
  0x3f   : > { %v3568_v7 = vrot.slane %v735_v63, %v3538_v25  ;;  %v750_v9 = vrot.slane %v736_v1, %v3538_v25  ;;  %v751_v14 = vcombine.low %v686_v4, %v702_v5  ;;  %v752_v17 = vcombine.high %v686_v4, %v702_v5 }
  0x40   : > { %v727_v24 = vrot.slane %v719_v13, %v3538_v25  ;;  %v734_v27 = vrot.slane %v720_v16, %v3538_v25  ;;  %v511_v32 = vrot.slane %v3264_v10, %v3528_v15  ;;  %v518_v33 = vrot.slane %v3266_v11, %v3528_v15 }
  0x41   : > { %v768_v18 = vcombine.high %v3565_v6, %v3568_v7  ;;  %v767_v19 = vcombine.low %v3565_v6, %v3568_v7  ;;  %v770_v20 = vcombine.high %v718_v8, %v750_v9  ;;  %v769_v21 = vcombine.low %v718_v8, %v750_v9 }
  0x42   : > { %v759_v26 = vrot.slane %v751_v14, %v3538_v25  ;;  %v766_v28 = vrot.slane %v752_v17, %v3538_v25  ;;  %v527_v34 = vrot.slane %v3267_v12, %v3528_v15  ;;  %v534_v38 = vrot.slane %v3269_v22, %v3528_v15 }
  0x43   : > { %912 = vrot.lane.b32.xlu0 %v768_v18, %s4154_s15  ;;  %920 = vrot.lane.b32.xlu1 %v770_v20, %s4158_s16  ;;  %v543_v41 = vrot.slane %v3270_v23, %v3528_v15  ;;  %v550_v43 = vrot.slane %v3272_v29, %v3528_v15  ;;  %v559_v44 = vrot.slane %v3273_v30, %v3528_v15 }
  0x44   : > { %v771_v35 = vcombine.low %v727_v24, %v759_v26  ;;  %v772_v36 = vcombine.high %v727_v24, %v759_v26  ;;  %v773_v37 = vcombine.low %v734_v27, %v766_v28  ;;  %v567_v39 = vcombine.low %v511_v32, %v527_v34 }
  0x45   : > { %v568_v40 = vcombine.high %v511_v32, %v527_v34  ;;  %v774_v42 = vcombine.high %v734_v27, %v766_v28  ;;  %v566_v45 = vrot.slane %v3275_v31, %v3528_v15  ;;  %v583_v48 = vcombine.low %v518_v33, %v534_v38 }
  0x46   : > { %v575_v46 = vrot.slane %v567_v39, %v3538_v25  ;;  %v584_v49 = vcombine.high %v518_v33, %v534_v38  ;;  %v599_v50 = vcombine.low %v543_v41, %v559_v44  ;;  %v600_v51 = vcombine.high %v543_v41, %v559_v44 }
  0x47   : > { %916 = vrot.lane.b32.xlu0 %v769_v21, %s4156_s17  ;;  %924 = vrot.lane.b32.xlu1 %v771_v35, %s4160_s26  ;;  %v582_v47 = vrot.slane %v568_v40, %v3538_v25  ;;  %v615_v52 = vcombine.low %v550_v43, %v566_v45  ;;  %v591_v53 = vrot.slane %v583_v48, %v3538_v25  ;;  %v3395_v35 = vmov 0.0  }
  0x48   : > { %v616_v56 = vcombine.high %v550_v43, %v566_v45  ;;  %v598_v57 = vrot.slane %v584_v49, %v3538_v25  ;;  %v607_v58 = vrot.slane %v599_v50, %v3538_v25  ;;  %v614_v59 = vrot.slane %v600_v51, %v3538_v25  ;;  %3122 = vmatprep.subr.mxu0 %v3395_v35 }
  0x49   : > { %v3051_v54 = vcombine.low %v575_v46, %v582_v47  ;;  %v3053_v55 = vcombine.high %v575_v46, %v582_v47  ;;  %v623_v60 = vrot.slane %v615_v52, %v3538_v25  ;;  %3124 = vmatprep.mubr.msk.f32.mxu0 %vm3396_vm0, %v3395_v35 }
  0x4a   : > { %v630_v63 = vrot.slane %v616_v56, %v3538_v25  ;;  %v3055_v0 = vcombine.low %v591_v53, %v598_v57  ;;  %v3057_v1 = vcombine.high %v591_v53, %v598_v57  ;;  %v3052_v2 = vcombine.low %v607_v58, %v614_v59 }
  0x4b   : > { %928 = vrot.lane.b32.xlu0 %v772_v36, %s3390_s27  ;;  %932 = vrot.lane.b32.xlu1 %v773_v37, %s4165_s30  ;;  %v783_v61 = vrot.slane %v3051_v54, %v3528_v15  ;;  %v799_v62 = vrot.slane %v3053_v55, %v3528_v15  ;;  %v3054_v3 = vcombine.high %v607_v58, %v614_v59 }
  0x4c   : > { %v3056_v8 = vcombine.low %v623_v60, %v630_v63  ;;  %v3058_v9 = vcombine.high %v623_v60, %v630_v63  ;;  %v815_v10 = vrot.slane %v3055_v0, %v3528_v15  ;;  %v831_v11 = vrot.slane %v3057_v1, %v3528_v15 }
  0x4d   : > { %v839_v4 = vcombine.low %v783_v61, %v799_v62  ;;  %v840_v5 = vcombine.high %v783_v61, %v799_v62  ;;  %v790_v12 = vrot.slane %v3052_v2, %v3528_v15  ;;  %v806_v13 = vrot.slane %v3054_v3, %v3528_v15 }
  0x4e   : > { %v822_v14 = vrot.slane %v3056_v8, %v3528_v15  ;;  %v838_v16 = vrot.slane %v3058_v9, %v3528_v15  ;;  %v871_v18 = vcombine.low %v815_v10, %v831_v11  ;;  %v872_v20 = vcombine.high %v815_v10, %v831_v11 }
  0x4f   : > { %936 = vrot.lane.b32.xlu0 %v774_v42, %s3392_s9  ;;  %v847_v17 = vrot.slane %v839_v4, %v3538_v25  ;;  %v855_v21 = vcombine.low %v790_v12, %v806_v13  ;;  %v854_v24 = vrot.slane %v840_v5, %v3538_v25  ;;  %v856_v31 = vcombine.high %v790_v12, %v806_v13 }
  0x50   : > { %v887_v22 = vcombine.low %v822_v14, %v838_v16  ;;  %v879_v23 = vrot.slane %v871_v18, %v3538_v25  ;;  %v886_v26 = vrot.slane %v872_v20, %v3538_v25  ;;  %v888_v32 = vcombine.high %v822_v14, %v838_v16 }
  0x51   : > { %v863_v29 = vrot.slane %v855_v21, %v3538_v25  ;;  %v1001_v36 = vcombine.low %v3395_v35, %v3395_v35  ;;  %v1002_v37 = vcombine.high %v3395_v35, %v3395_v35  ;;  %v870_v39 = vrot.slane %v856_v31, %v3538_v25 }
  0x52   : > { %v903_v27 = vcombine.low %v847_v17, %v879_v23  ;;  %v904_v28 = vcombine.high %v847_v17, %v879_v23  ;;  %v895_v30 = vrot.slane %v887_v22, %v3538_v25  ;;  %v905_v33 = vcombine.low %v854_v24, %v886_v26 }
  0x53   : > { %v906_v34 = vcombine.high %v854_v24, %v886_v26  ;;  %v902_v40 = vrot.slane %v888_v32, %v3538_v25  ;;  %v1009_v42 = vrot.slane %v1001_v36, %v3528_v15  ;;  %v1016_v43 = vrot.slane %v1002_v37, %v3528_v15 }
  0x54   : > { %940 = vrot.lane.b32.xlu1 %v903_v27, %s3393_s6  ;;  %944 = vrot.lane.b32.xlu0 %v904_v28, %s4148_s10  ;;  %v907_v38 = vcombine.low %v863_v29, %v895_v30  ;;  %v908_v41 = vcombine.high %v863_v29, %v895_v30  ;;  %s4159_s10 = smov 104  }
  0x55   : > { %v1017_v44 = vcombine.low %v1009_v42, %v1009_v42  ;;  %v1018_v45 = vcombine.high %v1009_v42, %v1009_v42  ;;  %v909_v46 = vcombine.low %v870_v39, %v902_v40  ;;  %v910_v47 = vcombine.high %v870_v39, %v902_v40 }
  0x56   : > { %v1033_v50 = vcombine.low %v1016_v43, %v1016_v43  ;;  %v1034_v51 = vcombine.high %v1016_v43, %v1016_v43 }
  0x57   : > { %v1025_v48 = vrot.slane %v1017_v44, %v3538_v25  ;;  %v1032_v49 = vrot.slane %v1018_v45, %v3538_v25 }
  0x58   : > { %948 = vrot.lane.b32.xlu1 %v905_v33, %s4152_s11  ;;  %952 = vrot.lane.b32.xlu0 %v906_v34, %s4150_s13  ;;  %s4163_s13 = smov 112   ;;  %s4162_s11 = smov 120   ;;  %v1041_v54 = vrot.slane %v1033_v50, %v3538_v25  ;;  %v1048_v57 = vrot.slane %v1034_v51, %v3538_v25 }
  0x59   : > { %v1050_v52 = vcombine.high %v1025_v48, %v1025_v48  ;;  %v1051_v53 = vcombine.low %v1032_v49, %v1032_v49  ;;  %v1052_v55 = vcombine.high %v1032_v49, %v1032_v49  ;;  %v3647_v61 = vcombine.low %v1025_v48, %v1025_v48 }
  0x5a   : > { %v1053_v56 = vcombine.low %v1041_v54, %v1041_v54  ;;  %v1054_v58 = vcombine.high %v1041_v54, %v1041_v54  ;;  %v1055_v59 = vcombine.low %v1048_v57, %v1048_v57  ;;  %v1056_v60 = vcombine.high %v1048_v57, %v1048_v57 }
  0x5c   : > { %956 = vrot.lane.b32.xlu1 %v907_v38, %s4167_s14  ;;  %960 = vrot.lane.b32.xlu0 %v908_v41, %s4159_s10 }
  0x60   : > { %964 = vrot.lane.b32.xlu1 %v909_v46, %s4163_s13  ;;  %968 = vrot.lane.b32.xlu0 %v910_v47, %s4162_s11 }
  0x64   : > { %1058 = vrot.lane.b32.xlu1 %v1050_v52, %s4154_s15  ;;  %1062 = vrot.lane.b32.xlu0 %v1051_v53, %s4156_s17  ;;  %s4172_s15 = smov 72   ;;  %s4173_s17 = smov 80  }
  0x68   : > { %1066 = vrot.lane.b32.xlu1 %v1052_v55, %s4158_s16  ;;  %1070 = vrot.lane.b32.xlu0 %v1053_v56, %s4160_s26  ;;  %s4174_s16 = smov 88  }
  0x6c   : > { %1074 = vrot.lane.b32.xlu1 %v1054_v58, %s3390_s27  ;;  %1078 = vrot.lane.b32.xlu0 %v1055_v59, %s4165_s30 }
  0x70   : > { %1082 = vrot.lane.b32.xlu1 %v1056_v60, %s3392_s9  ;;  %1086 = vrot.lane.b32.xlu0 %v3647_v61, %s3393_s6 }
  0x74   : > { %1089 = vrot.lane.b32.xlu1 %v1050_v52, %s4172_s15  ;;  %1092 = vrot.lane.b32.xlu0 %v1051_v53, %s4173_s17 }
  0x78   : > { %1095 = vrot.lane.b32.xlu1 %v1052_v55, %s4174_s16  ;;  %1098 = vrot.lane.b32.xlu0 %v1053_v56, %s4167_s14 }
  0x7c   : > { %1101 = vrot.lane.b32.xlu1 %v1054_v58, %s4159_s10  ;;  %1104 = vrot.lane.b32.xlu0 %v1055_v59, %s4163_s13  ;;  %s337_s10 = scalar_select %p336_p2, %s3366_s21, 1 }
  0x7d   : > { %s4180_s13 = smov 16  }
  0x7e   : > { %s3042_s26 = sshll.u32 %s337_s10, 3  ;;  %s4178_s10 = smov 32  }
  0x7f   : > { %s339_s30 = scalar_lea.vmem %s4145_s3, %s3042_s26  ;;  %s4181_s26 = smov 24  }
  0x80   : > { %1107 = vrot.lane.b32.xlu1 %v1056_v60, %s4162_s11  ;;  %v350_v29 = vld [vmem:[%s339_s30] sm:$0xff]  ;;  %s4179_s11 = smov 104   ;;  %s3735_s30 = sand.u32 1, %s3358_s19  }
  0xb5   : > { %v913_v62 = vpop.permute.xlu0 %912  ;;  %v921_v63 = vpop.permute.xlu1 %920 }
  0xb6   : > { %v972_v0 = vsel %vm971_vm1, %v767_v19, %v913_v62 }
  0xb9   : > { %v917_v1 = vpop.permute.xlu0 %916  ;;  %v925_v3 = vpop.permute.xlu1 %924 }
  0xba   : > { %v974_v2 = vsel %vm973_vm2, %v972_v0, %v917_v1  ;;  %v1788_v0 = vld [vmem:[%s4146_s4] sm:$0xff] }
  0xbb   : > { %v976_v4 = vsel %vm975_vm3, %v974_v2, %v921_v63  ;;  %3158 = vmatprep.subr.mxu1 %v1788_v0 }
  0xbc   : > { %v978_v8 = vsel %vm977_vm4, %v976_v4, %v925_v3  ;;  %3159 = vmatpush3.msra.mxu1 %v1788_v0 }
  0xbd   : > { %v929_v5 = vpop.permute.xlu0 %928  ;;  %v933_v6 = vpop.permute.xlu1 %932 }
  0xbe   : > { %v980_v9 = vsel %vm979_vm5, %v978_v8, %v929_v5 }
  0xbf   : > { %v982_v19 = vsel %vm981_vm6, %v980_v9, %v933_v6 }
  0xc1   : > { %v937_v7 = vpop.permute.xlu0 %936 }
  0xc2   : > { %v984_v10 = vsel %vm983_vm7, %v982_v19, %v937_v7 }
  0xc6   : > { %v941_v11 = vpop.permute.xlu1 %940  ;;  %v945_v12 = vpop.permute.xlu0 %944 }
  0xc7   : > { %v986_v13 = vsel %vm985_vm8, %v984_v10, %v941_v11 }
  0xc8   : > { %v988_v14 = vsel %vm987_vm9, %v986_v13, %v945_v12 }
  0xca   : > { %v949_v16 = vpop.permute.xlu1 %948  ;;  %v953_v17 = vpop.permute.xlu0 %952 }
  0xcb   : > { %v990_v18 = vsel %vm989_vm10, %v988_v14, %v949_v16 }
  0xcc   : > { %v992_v20 = vsel %vm991_vm11, %v990_v18, %v953_v17 }
  0xce   : > { %v957_v21 = vpop.permute.xlu1 %956  ;;  %v961_v22 = vpop.permute.xlu0 %960 }
  0xcf   : > { %v994_v23 = vsel %vm993_vm12, %v992_v20, %v957_v21 }
  0xd0   : > { %v996_v24 = vsel %vm995_vm13, %v994_v23, %v961_v22 }
  0xd2   : > { %v965_v26 = vpop.permute.xlu1 %964  ;;  %v969_v27 = vpop.permute.xlu0 %968 }
  0xd3   : > { %v998_v28 = vsel %vm997_vm14, %v996_v24, %v965_v26 }
  0xd4   : > { %v1000_v30 = vsel %vm999_vm15, %v998_v28, %v969_v27 }
  0xd5   : > { %3123 = vmatpush3.msra.mxu0 %v1000_v30 }
  0xd6   : > { %3125 = vmatmul.mubr.msk.f32.vlgmr.msra.gmra.mrb[0].mxu0 %vm971_vm1, %v350_v29  ;;  %v1059_v31 = vpop.permute.xlu1 %1058  ;;  %v1063_v32 = vpop.permute.xlu0 %1062  ;;  %3127 = vmatprep.subr.mxu0 %v1788_v0 }
  0xd7   : > { %v1110_v33 = vsel %vm971_vm1, %v3647_v61, %v1059_v31  ;;  %3128 = vmatpush3.msra.mxu0 %v1788_v0 }
  0xd8   : > { %v1111_v34 = vsel %vm973_vm2, %v1110_v33, %v1063_v32 }
  0xda   : > { %v1067_v35 = vpop.permute.xlu1 %1066  ;;  %v1071_v36 = vpop.permute.xlu0 %1070 }
  0xdb   : > { %v1112_v37 = vsel %vm975_vm3, %v1111_v34, %v1067_v35 }
  0xdc   : > { %v1113_v38 = vsel %vm977_vm4, %v1112_v37, %v1071_v36 }
  0xde   : > { %v1075_v39 = vpop.permute.xlu1 %1074  ;;  %v1079_v40 = vpop.permute.xlu0 %1078 }
  0xdf   : > { %v1114_v41 = vsel %vm979_vm5, %v1113_v38, %v1075_v39 }
  0xe0   : > { %v1115_v42 = vsel %vm981_vm6, %v1114_v41, %v1079_v40 }
  0xe2   : > { %v1083_v43 = vpop.permute.xlu1 %1082  ;;  %v1087_v44 = vpop.permute.xlu0 %1086 }
  0xe3   : > { %v1116_v45 = vsel %vm983_vm7, %v1115_v42, %v1083_v43 }
  0xe4   : > { %v1117_v46 = vsel %vm985_vm8, %v1116_v45, %v1087_v44 }
  0xe6   : > { %v1090_v47 = vpop.permute.xlu1 %1089  ;;  %v1093_v48 = vpop.permute.xlu0 %1092 }
  0xe7   : > { %v1118_v49 = vsel %vm987_vm9, %v1117_v46, %v1090_v47 }
  0xe8   : > { %v1119_v50 = vsel %vm989_vm10, %v1118_v49, %v1093_v48 }
  0xea   : > { %v1096_v51 = vpop.permute.xlu1 %1095  ;;  %v1099_v52 = vpop.permute.xlu0 %1098 }
  0xeb   : > { %v1120_v53 = vsel %vm991_vm11, %v1119_v50, %v1096_v51 }
  0xec   : > { %v1121_v54 = vsel %vm993_vm12, %v1120_v53, %v1099_v52 }
  0xee   : > { %v1102_v55 = vpop.permute.xlu1 %1101  ;;  %v1105_v56 = vpop.permute.xlu0 %1104 }
  0xef   : > { %v1122_v57 = vsel %vm995_vm13, %v1121_v54, %v1102_v55 }
  0xf0   : > { %v1123_v58 = vsel %vm997_vm14, %v1122_v57, %v1105_v56 }
  0xf2   : > { %v1108_v59 = vpop.permute.xlu1 %1107 }
  0xf3   : > { %v1124_v60 = vsel %vm999_vm15, %v1123_v58, %v1108_v59 }
 0x1a9   : > { %v1194_v61 = vpop.f32.mrb[0].mxu0 }
 0x1aa   : > { %v3699_v62 = vadd.f32 %v1194_v61, %v1124_v60  ;;  %v3126_v63 = vpop.f32.mrb[1].mxu0 }
 0x1ac   : > { %1211 = vrot.lane.b32.xlu1 %v3699_v62, %s4174_s16  ;;  %1208 = vrot.lane.b32.xlu0 %v3699_v62, %s4167_s14  ;;  %s4176_s16 = smov 112   ;;  %s3038_s14 = sshll.u32 %s3735_s30, 6 }
 0x1b0   : > { %1217 = vrot.lane.b32.xlu1 %v3699_v62, %s4172_s15  ;;  %1214 = vrot.lane.b32.xlu0 %v3699_v62, %s4173_s17  ;;  %s4175_s15 = smov 48  }
 0x1b4   : > { %1223 = vrot.lane.b32.xlu1 %v3699_v62, %s3392_s9  ;;  %1220 = vrot.lane.b32.xlu0 %v3699_v62, %s3393_s6  ;;  %s4177_s9 = smov 120  }
 0x1b8   : > { %1229 = vrot.lane.b32.xlu1 %v3699_v62, %s3390_s27  ;;  %1226 = vrot.lane.b32.xlu0 %v3699_v62, %s4175_s15  ;;  %s4182_s27 = smov 8  }
 0x1bc   : > { %1202 = vrot.lane.b32.xlu1 %v3699_v62, %s4176_s16  ;;  %1199 = vrot.lane.b32.xlu0 %v3699_v62, %s4177_s9  ;;  %s297_s9 = scalar_lea.vmem [#allocation2], %s3038_s14  ;;  %s4183_s14 = smov 96  }
 0x1bd   : > { %v3276_v1 = vld [vmem:[%s297_s9] ss:$16 sps:$4 sm:$0xff]   ;;  %v3278_v2 = vld [vmem:[%s297_s9 + $0x8] ss:$16 sps:$4 sm:$0xff]   ;;  %v3284_v8 = vld [vmem:[%s297_s9 + $0x4] ss:$16 sps:$4 sm:$0xff]  }
 0x1be   : > { %v3280_v3 = vld [vmem:[%s297_s9 + $0x20] ss:$16 sps:$4 sm:$0xff]   ;;  %v3282_v4 = vld [vmem:[%s297_s9 + $0x28] ss:$16 sps:$4 sm:$0xff]   ;;  %v1990_v5 = vrot.slane %v3276_v1, %v3528_v15  ;;  %v3285_v9 = vld [vmem:[%s297_s9 + $0xc] ss:$16 sps:$4 sm:$0xff]   ;;  %v2006_v7 = vrot.slane %v3278_v2, %v3528_v15  ;;  %v1997_v12 = vrot.slane %v3284_v8, %v3528_v15 }
 0x1bf   : > { %v3286_v6 = vld [vmem:[%s297_s9 + $0x24] ss:$16 sps:$4 sm:$0xff]   ;;  %v2022_v19 = vrot.slane %v3280_v3, %v3528_v15  ;;  %v2038_v10 = vrot.slane %v3282_v4, %v3528_v15  ;;  %v3287_v11 = vld [vmem:[%s297_s9 + $0x2c] ss:$16 sps:$4 sm:$0xff]   ;;  %v2013_v13 = vrot.slane %v3285_v9, %v3528_v15 }
 0x1c0   : > { %1232 = vrot.lane.b32.xlu1 %v3699_v62, %s4178_s10  ;;  %1205 = vrot.lane.b32.xlu0 %v3699_v62, %s4179_s11  ;;  %v2029_v14 = vrot.slane %v3286_v6, %v3528_v15  ;;  %v2046_v16 = vcombine.low %v1990_v5, %v2006_v7  ;;  %v2047_v18 = vcombine.high %v1990_v5, %v2006_v7  ;;  %s3403_s11 = smov [#allocation3]  }
 0x1c1   : > { %v2078_v17 = vcombine.low %v2022_v19, %v2038_v10  ;;  %v2079_v20 = vcombine.high %v2022_v19, %v2038_v10  ;;  %v2045_v21 = vrot.slane %v3287_v11, %v3528_v15  ;;  %v2062_v22 = vcombine.low %v1997_v12, %v2013_v13 }
 0x1c2   : > { %v2063_v23 = vcombine.high %v1997_v12, %v2013_v13  ;;  %v3747_v24 = vrot.slane %v2046_v16, %v3538_v25  ;;  %v2061_v27 = vrot.slane %v2047_v18, %v3538_v25 }
 0x1c3   : > { %v3750_v26 = vrot.slane %v2078_v17, %v3538_v25  ;;  %v2093_v28 = vrot.slane %v2079_v20, %v3538_v25  ;;  %v2070_v29 = vrot.slane %v2062_v22, %v3538_v25  ;;  %v2094_v30 = vcombine.low %v2029_v14, %v2045_v21 }
 0x1c4   : > { %1238 = vrot.lane.b32.xlu1 %v3699_v62, %s4180_s13  ;;  %1235 = vrot.lane.b32.xlu0 %v3699_v62, %s4181_s26  ;;  %v2095_v31 = vcombine.high %v2029_v14, %v2045_v21  ;;  %v2077_v37 = vrot.slane %v2063_v23, %v3538_v25  ;;  %s2909_s26 = scalar_lea.sflag [#allocation4], %s3735_s30 }
 0x1c5   : > { %v2111_v32 = vcombine.high %v3747_v24, %v3750_v26  ;;  %v2112_v33 = vcombine.low %v2061_v27, %v2093_v28  ;;  %v2110_v34 = vcombine.low %v3747_v24, %v3750_v26  ;;  %v2102_v35 = vrot.slane %v2094_v30, %v3538_v25  ;;  %v341_v24 = vld [vmem:[%s4144_s2 + $0x8] sm:$0xff] }
 0x1c6   : > { %v2113_v36 = vcombine.high %v2061_v27, %v2093_v28  ;;  %v2109_v38 = vrot.slane %v2095_v31, %v3538_v25 }
 0x1c7   : > { %v2114_v39 = vcombine.low %v2070_v29, %v2102_v35  ;;  %v2115_v40 = vcombine.high %v2070_v29, %v2102_v35 }
 0x1c8   : > { %1241 = vrot.lane.b32.xlu0 %v3699_v62, %s4182_s27  ;;  %2119 = vrot.lane.b32.xlu1 %v2111_v32, %s4180_s13  ;;  %v2116_v41 = vcombine.low %v2077_v37, %v2109_v38  ;;  %v2117_v42 = vcombine.high %v2077_v37, %v2109_v38 }
 0x1cc   : > { %2123 = vrot.lane.b32.xlu0 %v2112_v33, %s4178_s10  ;;  %2127 = vrot.lane.b32.xlu1 %v2113_v36, %s4175_s15 }
 0x1d0   : > { %2131 = vrot.lane.b32.xlu0 %v2114_v39, %s3393_s6  ;;  %2135 = vrot.lane.b32.xlu1 %v2115_v40, %s4173_s17 }
 0x1d4   : > { %2139 = vrot.lane.b32.xlu0 %v2116_v41, %s4183_s14  ;;  %2143 = vrot.lane.b32.xlu1 %v2117_v42, %s4176_s16 }
 0x21e   : > { %v1212_v43 = vpop.permute.xlu1 %1211  ;;  %v1209_v44 = vpop.permute.xlu0 %1208 }
 0x222   : > { %v1218_v45 = vpop.permute.xlu1 %1217  ;;  %v1215_v46 = vpop.permute.xlu0 %1214 }
 0x223   : > { %v1292_v47 = vcombine.low %v1212_v43, %v1218_v45  ;;  %v1293_v48 = vcombine.high %v1212_v43, %v1218_v45  ;;  %v1276_v49 = vcombine.low %v1209_v44, %v1215_v46  ;;  %v1277_v50 = vcombine.high %v1209_v44, %v1215_v46 }
 0x225   : > { %v1300_v51 = vrot.slane %v1292_v47, %v3528_v15  ;;  %v1307_v52 = vrot.slane %v1293_v48, %v3528_v15  ;;  %v1284_v53 = vrot.slane %v1276_v49, %v3528_v15  ;;  %v1291_v54 = vrot.slane %v1277_v50, %v3528_v15 }
 0x226   : > { %v1224_v55 = vpop.permute.xlu1 %1223  ;;  %v1221_v56 = vpop.permute.xlu0 %1220 }
 0x227   : > { %v1340_v57 = vcombine.low %v1284_v53, %v1300_v51  ;;  %v1341_v58 = vcombine.high %v1284_v53, %v1300_v51  ;;  %v1356_v59 = vcombine.low %v1291_v54, %v1307_v52  ;;  %v1357_v60 = vcombine.high %v1291_v54, %v1307_v52 }
 0x229   : > { %v1348_v61 = vrot.slane %v1340_v57, %v3538_v25  ;;  %v1355_v63 = vrot.slane %v1341_v58, %v3538_v25  ;;  %v1364_v0 = vrot.slane %v1356_v59, %v3538_v25  ;;  %v1371_v1 = vrot.slane %v1357_v60, %v3538_v25 }
 0x22a   : > { %v1230_v2 = vpop.permute.xlu1 %1229  ;;  %v1227_v3 = vpop.permute.xlu0 %1226 }
 0x22b   : > { %v1396_v4 = vcombine.low %v1224_v55, %v1230_v2  ;;  %v1397_v5 = vcombine.high %v1224_v55, %v1230_v2  ;;  %v1380_v8 = vcombine.low %v1221_v56, %v1227_v3  ;;  %v1381_v9 = vcombine.high %v1221_v56, %v1227_v3 }
 0x22c   : > { %v3061_v6 = vcombine.low %v1348_v61, %v1355_v63  ;;  %v3063_v7 = vcombine.high %v1348_v61, %v1355_v63  ;;  %v3065_v19 = vcombine.low %v1364_v0, %v1371_v1  ;;  %v3067_v10 = vcombine.high %v1364_v0, %v1371_v1 }
 0x22d   : > { %v1404_v11 = vrot.slane %v1396_v4, %v3528_v15  ;;  %v1411_v12 = vrot.slane %v1397_v5, %v3528_v15  ;;  %v1388_v13 = vrot.slane %v1380_v8, %v3528_v15  ;;  %v1395_v14 = vrot.slane %v1381_v9, %v3528_v15 }
 0x22e   : > { %v1203_v16 = vpop.permute.xlu1 %1202  ;;  %v1200_v17 = vpop.permute.xlu0 %1199  ;;  %v3782_v18 = vrot.slane %v3061_v6, %v3528_v15  ;;  %v3785_v20 = vrot.slane %v3063_v7, %v3528_v15  ;;  %v3788_v21 = vrot.slane %v3065_v19, %v3528_v15  ;;  %v3793_v31 = vrot.slane %v3067_v10, %v3528_v15 }
 0x22f   : > { %v1444_v22 = vcombine.low %v1388_v13, %v1404_v11  ;;  %v1445_v23 = vcombine.high %v1388_v13, %v1404_v11  ;;  %v1460_v27 = vcombine.low %v1395_v14, %v1411_v12  ;;  %v1461_v28 = vcombine.high %v1395_v14, %v1411_v12 }
 0x230   : > { %v1244_v29 = vcombine.low %v3699_v62, %v1203_v16  ;;  %v1245_v30 = vcombine.high %v3699_v62, %v1203_v16  ;;  %v1597_v32 = vcombine.high %v3782_v18, %v3785_v20  ;;  %v1596_v41 = vcombine.low %v3782_v18, %v3785_v20 }
 0x231   : > { %v1452_v33 = vrot.slane %v1444_v22, %v3538_v25  ;;  %v1459_v35 = vrot.slane %v1445_v23, %v3538_v25  ;;  %v1468_v36 = vrot.slane %v1460_v27, %v3538_v25  ;;  %v1475_v37 = vrot.slane %v1461_v28, %v3538_v25 }
 0x232   : > { %v1252_v38 = vrot.slane %v1244_v29, %v3528_v15  ;;  %v1259_v39 = vrot.slane %v1245_v30, %v3528_v15  ;;  %v1233_v40 = vpop.permute.xlu1 %1232  ;;  %v1206_v62 = vpop.permute.xlu0 %1205  ;;  %v1611_v48 = vrot.slane %v1597_v32, %v3538_v25  ;;  %v1629_v49 = vcombine.high %v3788_v21, %v3793_v31 }
 0x233   : > { %v3068_v42 = vcombine.low %v1452_v33, %v1459_v35  ;;  %v3070_v43 = vcombine.high %v1452_v33, %v1459_v35  ;;  %v3072_v44 = vcombine.low %v1468_v36, %v1475_v37  ;;  %v3074_v45 = vcombine.high %v1468_v36, %v1475_v37 }
 0x234   : > { %v1260_v46 = vcombine.low %v1200_v17, %v1206_v62  ;;  %v1261_v47 = vcombine.high %v1200_v17, %v1206_v62  ;;  %v1628_v56 = vcombine.low %v3788_v21, %v3793_v31  ;;  %v1643_v57 = vrot.slane %v1629_v49, %v3538_v25 }
 0x235   : > { %v1660_v50 = vrot.slane %v3068_v42, %v3528_v15  ;;  %v1676_v51 = vrot.slane %v3070_v43, %v3528_v15  ;;  %v1692_v52 = vrot.slane %v3072_v44, %v3528_v15  ;;  %v1708_v53 = vrot.slane %v3074_v45, %v3528_v15 }
 0x236   : > { %v1268_v54 = vrot.slane %v1260_v46, %v3528_v15  ;;  %v1275_v55 = vrot.slane %v1261_v47, %v3528_v15  ;;  %v1239_v58 = vpop.permute.xlu1 %1238  ;;  %v1236_v59 = vpop.permute.xlu0 %1235  ;;  %v1650_v5 = vcombine.low %v1611_v48, %v1643_v57  ;;  %v1651_v8 = vcombine.high %v1611_v48, %v1643_v57 }
 0x237   : > { %v1412_v60 = vcombine.low %v1233_v40, %v1239_v58  ;;  %v1413_v61 = vcombine.high %v1233_v40, %v1239_v58  ;;  %v1716_v63 = vcombine.low %v1660_v50, %v1676_v51  ;;  %v1748_v0 = vcombine.low %v1692_v52, %v1708_v53 }
 0x238   : > { %v1308_v1 = vcombine.low %v1252_v38, %v1268_v54  ;;  %v1309_v2 = vcombine.high %v1252_v38, %v1268_v54  ;;  %v1324_v3 = vcombine.low %v1259_v39, %v1275_v55  ;;  %v1325_v4 = vcombine.high %v1259_v39, %v1275_v55  ;;  %3138 = vmatprep.mubr.msk.f32.mxu1 %vm971_vm1, %v1650_v5 }
 0x239   : > { %v1420_v9 = vrot.slane %v1412_v60, %v3528_v15  ;;  %v1427_v6 = vrot.slane %v1413_v61, %v3528_v15  ;;  %v1724_v16 = vrot.slane %v1716_v63, %v3538_v25  ;;  %v1756_v17 = vrot.slane %v1748_v0, %v3538_v25  ;;  %3139 = vmatmul.mubr.msk.f32.vlgmr.msra.gmra.mrb[0].mxu1 %vm971_vm1, %v1651_v8 }
 0x23a   : > { %v1316_v7 = vrot.slane %v1308_v1, %v3538_v25  ;;  %v1323_v19 = vrot.slane %v1309_v2, %v3538_v25  ;;  %v1332_v10 = vrot.slane %v1324_v3, %v3538_v25  ;;  %v1339_v11 = vrot.slane %v1325_v4, %v3538_v25  ;;  %v1242_v12 = vpop.permute.xlu0 %1241 }
 0x23b   : > { %v1428_v13 = vcombine.low %v1236_v59, %v1242_v12  ;;  %v1429_v14 = vcombine.high %v1236_v59, %v1242_v12  ;;  %v1780_v32 = vcombine.low %v1724_v16, %v1756_v17  ;;  %v1781_v33 = vcombine.high %v1724_v16, %v1756_v17 }
 0x23c   : > { %v3060_v22 = vcombine.low %v1316_v7, %v1323_v19  ;;  %v3062_v23 = vcombine.high %v1316_v7, %v1323_v19  ;;  %v3064_v27 = vcombine.low %v1332_v10, %v1339_v11  ;;  %v3066_v28 = vcombine.high %v1332_v10, %v1339_v11 }
 0x23d   : > { %v1436_v29 = vrot.slane %v1428_v13, %v3528_v15  ;;  %v1443_v30 = vrot.slane %v1429_v14, %v3528_v15  ;;  %3141 = vmatprep.mubr.msk.f32.mxu1 %vm971_vm1, %v1780_v32  ;;  %v1717_v43 = vcombine.high %v1660_v50, %v1676_v51  ;;  %v1749_v44 = vcombine.high %v1692_v52, %v1708_v53 }
 0x23e   : > { %v1524_v35 = vrot.slane %v3060_v22, %v3528_v15  ;;  %v1540_v36 = vrot.slane %v3062_v23, %v3528_v15  ;;  %v1556_v37 = vrot.slane %v3064_v27, %v3528_v15  ;;  %v1572_v38 = vrot.slane %v3066_v28, %v3528_v15  ;;  %3142 = vmatmul.mubr.msk.f32.gmra.mrb[2].mxu1 %vm971_vm1, %v1781_v33  ;;  %v340_v27 = vld [vmem:[%s4144_s2] sm:$0xff] }
 0x23f   : > { %v1476_v39 = vcombine.low %v1420_v9, %v1436_v29  ;;  %v1477_v40 = vcombine.high %v1420_v9, %v1436_v29  ;;  %v1492_v62 = vcombine.low %v1427_v6, %v1443_v30  ;;  %v1493_v42 = vcombine.high %v1427_v6, %v1443_v30  ;;  %v2120_v29 = vpop.permute.xlu1 %2119  ;;  %v2124_v30 = vpop.permute.xlu0 %2123 }
 0x240   : > { %v1580_v45 = vcombine.low %v1524_v35, %v1540_v36  ;;  %v1612_v46 = vcombine.low %v1556_v37, %v1572_v38  ;;  %v1731_v55 = vrot.slane %v1717_v43, %v3538_v25  ;;  %v1763_v57 = vrot.slane %v1749_v44, %v3538_v25 }
 0x241   : > { %v1484_v47 = vrot.slane %v1476_v39, %v3538_v25  ;;  %v1491_v48 = vrot.slane %v1477_v40, %v3538_v25  ;;  %v1500_v49 = vrot.slane %v1492_v62, %v3538_v25  ;;  %v1507_v54 = vrot.slane %v1493_v42, %v3538_v25 }
 0x242   : > { %v1588_v58 = vrot.slane %v1580_v45, %v3538_v25  ;;  %v1620_v59 = vrot.slane %v1612_v46, %v3538_v25  ;;  %v1782_v60 = vcombine.low %v1731_v55, %v1763_v57  ;;  %v1783_v61 = vcombine.high %v1731_v55, %v1763_v57 }
 0x243   : > { %v3069_v50 = vcombine.low %v1484_v47, %v1491_v48  ;;  %v3071_v51 = vcombine.high %v1484_v47, %v1491_v48  ;;  %v3073_v52 = vcombine.low %v1500_v49, %v1507_v54  ;;  %v3075_v53 = vcombine.high %v1500_v49, %v1507_v54 }
 0x244   : > { %v1644_v63 = vcombine.low %v1588_v58, %v1620_v59  ;;  %v1645_v0 = vcombine.high %v1588_v58, %v1620_v59  ;;  %3144 = vmatprep.mubr.msk.f32.mxu1 %vm971_vm1, %v1782_v60  ;;  %v1581_v5 = vcombine.high %v1524_v35, %v1540_v36  ;;  %v1613_v8 = vcombine.high %v1556_v37, %v1572_v38  ;;  %v2128_v35 = vpop.permute.xlu1 %2127  ;;  %v2132_v36 = vpop.permute.xlu0 %2131 }
 0x245   : > { %v1667_v1 = vrot.slane %v3069_v50, %v3528_v15  ;;  %v1683_v2 = vrot.slane %v3071_v51, %v3528_v15  ;;  %v1699_v3 = vrot.slane %v3073_v52, %v3528_v15  ;;  %v1715_v4 = vrot.slane %v3075_v53, %v3528_v15  ;;  %3145 = vmatmul.mubr.msk.f32.gmra.mrb[4].mxu1 %vm971_vm1, %v1783_v61 }
 0x246   : > { %3129 = vmatprep.mubr.msk.f32.mxu0 %vm971_vm1, %v1644_v63  ;;  %v1604_v9 = vrot.slane %v1596_v41, %v3538_v25  ;;  %v1636_v6 = vrot.slane %v1628_v56, %v3538_v25  ;;  %v1595_v10 = vrot.slane %v1581_v5, %v3538_v25  ;;  %v1627_v11 = vrot.slane %v1613_v8, %v3538_v25 }
 0x247   : > { %3130 = vmatmul.mubr.msk.f32.vlgmr.msra.gmra.mrb[2].mxu0 %vm971_vm1, %v1645_v0  ;;  %v1732_v7 = vcombine.low %v1667_v1, %v1683_v2  ;;  %v1764_v19 = vcombine.low %v1699_v3, %v1715_v4  ;;  %v1733_v12 = vcombine.high %v1667_v1, %v1683_v2  ;;  %v1765_v13 = vcombine.high %v1699_v3, %v1715_v4 }
 0x248   : > { %v1646_v41 = vcombine.low %v1595_v10, %v1627_v11  ;;  %v1647_v17 = vcombine.high %v1595_v10, %v1627_v11  ;;  %v1648_v56 = vcombine.low %v1604_v9, %v1636_v6  ;;  %v1649_v23 = vcombine.high %v1604_v9, %v1636_v6  ;;  %v2136_v39 = vpop.permute.xlu1 %2135  ;;  %v2140_v40 = vpop.permute.xlu0 %2139 }
 0x249   : > { %v1740_v18 = vrot.slane %v1732_v7, %v3538_v25  ;;  %v1772_v20 = vrot.slane %v1764_v19, %v3538_v25  ;;  %v1747_v14 = vrot.slane %v1733_v12, %v3538_v25  ;;  %v1779_v16 = vrot.slane %v1765_v13, %v3538_v25 }
 0x24a   : > { %3132 = vmatprep.mubr.msk.f32.mxu0 %vm971_vm1, %v1646_v41  ;;  %v2146_v32 = vsel %vm973_vm2, %v2110_v34, %v2120_v29 }
 0x24b   : > { %v1784_v21 = vcombine.low %v1740_v18, %v1772_v20  ;;  %v1785_v31 = vcombine.high %v1740_v18, %v1772_v20  ;;  %3133 = vmatmul.mubr.msk.f32.gmra.mrb[4].mxu0 %vm971_vm1, %v1647_v17  ;;  %v1786_v22 = vcombine.low %v1747_v14, %v1779_v16  ;;  %v1787_v28 = vcombine.high %v1747_v14, %v1779_v16 }
 0x24c   : > { %3135 = vmatprep.mubr.msk.f32.mxu0 %vm971_vm1, %v1648_v56  ;;  %v2147_v33 = vsel %vm977_vm4, %v2146_v32, %v2124_v30  ;;  %v2144_v43 = vpop.permute.xlu1 %2143 }
 0x24d   : > { %3147 = vmatprep.mubr.msk.f32.mxu1 %vm971_vm1, %v1784_v21  ;;  %v2148_v37 = vsel %vm981_vm6, %v2147_v33, %v2128_v35 }
 0x24e   : > { %3148 = vmatmul.mubr.msk.f32.gmra.mrb[6].mxu1 %vm971_vm1, %v1785_v31  ;;  %v2149_v38 = vsel %vm985_vm8, %v2148_v37, %v2132_v36 }
 0x24f   : > { %3150 = vmatprep.mubr.msk.f32.mxu1 %vm971_vm1, %v1786_v22  ;;  %3136 = vmatmul.mubr.msk.f32.gmra.mrb[6].mxu0 %vm971_vm1, %v1649_v23  ;;  %v2150_v62 = vsel %vm989_vm10, %v2149_v38, %v2136_v39 }
 0x250   : > { %3155 = vmatprep.mubr.msk.f32.mxu0 %vm971_vm1, %v340_v27  ;;  %v2151_v42 = vsel %vm993_vm12, %v2150_v62, %v2140_v40 }
 0x251   : > { %v2152_v44 = vsel %vm997_vm14, %v2151_v42, %v2144_v43 }
 0x252   : > { %3151 = vmatmul.mubr.msk.f32.gmra.mrb[8].mxu1 %vm971_vm1, %v1787_v28  ;;  %3153 = vmatprep.subr.mxu0 %v2152_v44 }
 0x253   : > { %3154 = vmatpush3.msra.mxu0 %v2152_v44 }
 0x254   : > { %3156 = vmatmul.mubr.msk.f32.vlgmr.msra.gmra.mrb[8].mxu0 %vm971_vm1, %v341_v24 }
 0x30c   : > { %v3140_v26 = vpop.f32.mrb[0].mxu1 }
 0x30d   : > { %v1933_v34 = vpop.f32.mrb[1].mxu1 }
 0x311   : > { %v3143_v45 = vpop.f32.mrb[2].mxu1 }
 0x312   : > { %v1943_v46 = vpop.f32.mrb[3].mxu1 }
 0x318   : > { %v3146_v47 = vpop.f32.mrb[4].mxu1 }
 0x319   : > { %v2305_v49 = vcombine.low %v3143_v45, %v3146_v47  ;;  %v2306_v54 = vcombine.high %v3143_v45, %v3146_v47  ;;  %v1953_v55 = vpop.f32.mrb[5].mxu1 }
 0x31a   : > { %v3131_v48 = vpop.f32.mrb[2].mxu0  ;;  %v2289_v58 = vcombine.low %v1943_v46, %v1953_v55  ;;  %v2290_v59 = vcombine.high %v1943_v46, %v1953_v55 }
 0x31b   : > { %v1903_v57 = vpop.f32.mrb[3].mxu0  ;;  %v2313_v50 = vrot.slane %v2305_v49, %v3528_v15  ;;  %v2320_v51 = vrot.slane %v2306_v54, %v3528_v15 }
 0x31c   : > { %v2297_v52 = vrot.slane %v2289_v58, %v3528_v15  ;;  %v2304_v53 = vrot.slane %v2290_v59, %v3528_v15 }
 0x31e   : > { %v2353_v60 = vcombine.low %v2297_v52, %v2313_v50  ;;  %v2354_v61 = vcombine.high %v2297_v52, %v2313_v50  ;;  %v2369_v63 = vcombine.low %v2304_v53, %v2320_v51  ;;  %v2370_v0 = vcombine.high %v2304_v53, %v2320_v51  ;;  %v3134_v1 = vpop.f32.mrb[4].mxu0 }
 0x31f   : > { %v2169_v2 = vcombine.low %v3131_v48, %v3134_v1  ;;  %v2170_v3 = vcombine.high %v3131_v48, %v3134_v1  ;;  %v1913_v4 = vpop.f32.mrb[5].mxu0 }
 0x320   : > { %v2153_v8 = vcombine.low %v1903_v57, %v1913_v4  ;;  %v2154_v9 = vcombine.high %v1903_v57, %v1913_v4  ;;  %v3900_v13 = vrot.slane %v2353_v60, %v3538_v25  ;;  %v3903_v18 = vrot.slane %v2354_v61, %v3538_v25 }
 0x321   : > { %v3149_v5 = vpop.f32.mrb[6].mxu1  ;;  %v2177_v7 = vrot.slane %v2169_v2, %v3528_v15  ;;  %v2184_v19 = vrot.slane %v2170_v3, %v3528_v15  ;;  %v3906_v17 = vrot.slane %v2369_v63, %v3538_v25  ;;  %v3909_v21 = vrot.slane %v2370_v0, %v3538_v25 }
 0x322   : > { %v1963_v6 = vpop.f32.mrb[7].mxu1  ;;  %v2161_v10 = vrot.slane %v2153_v8, %v3528_v15  ;;  %v2168_v11 = vrot.slane %v2154_v9, %v3528_v15  ;;  %v3137_v12 = vpop.f32.mrb[6].mxu0 }
 0x323   : > { %v2201_v20 = vcombine.low %v3137_v12, %v3140_v26  ;;  %v2202_v41 = vcombine.high %v3137_v12, %v3140_v26  ;;  %v1923_v14 = vpop.f32.mrb[7].mxu0 }
 0x324   : > { %v2217_v31 = vcombine.low %v2161_v10, %v2177_v7  ;;  %v2218_v56 = vcombine.high %v2161_v10, %v2177_v7  ;;  %v2233_v22 = vcombine.low %v2168_v11, %v2184_v19  ;;  %v2234_v23 = vcombine.high %v2168_v11, %v2184_v19 }
 0x325   : > { %v3152_v16 = vpop.f32.mrb[8].mxu1  ;;  %v2209_v28 = vrot.slane %v2201_v20, %v3528_v15  ;;  %v2216_v29 = vrot.slane %v2202_v41, %v3528_v15  ;;  %v2185_v30 = vcombine.low %v1923_v14, %v1933_v34  ;;  %v2186_v32 = vcombine.high %v1923_v14, %v1933_v34 }
 0x326   : > { %v1973_v27 = vpop.f32.mrb[9].mxu1  ;;  %v2337_v33 = vcombine.low %v3149_v5, %v3152_v16  ;;  %v2338_v35 = vcombine.high %v3149_v5, %v3152_v16  ;;  %v3916_v40 = vrot.slane %v2217_v31, %v3538_v25  ;;  %v2232_v62 = vrot.slane %v2218_v56, %v3538_v25 }
 0x327   : > { %v2321_v36 = vcombine.low %v1963_v6, %v1973_v27  ;;  %v2322_v37 = vcombine.high %v1963_v6, %v1973_v27  ;;  %v2193_v38 = vrot.slane %v2185_v30, %v3528_v15  ;;  %v2200_v39 = vrot.slane %v2186_v32, %v3528_v15  ;;  %v3157_v20 = vpop.f32.mrb[8].mxu0 }
 0x328   : > { %v2345_v42 = vrot.slane %v2337_v33, %v3528_v15  ;;  %v2352_v43 = vrot.slane %v2338_v35, %v3528_v15  ;;  %v2241_v58 = vrot.slane %v2233_v22, %v3538_v25  ;;  %v2248_v53 = vrot.slane %v2234_v23, %v3538_v25  ;;  %v2567_v41 = vpop.f32.mrb[9].mxu0 }
 0x329   : > { %v2329_v44 = vrot.slane %v2321_v36, %v3528_v15  ;;  %v2336_v24 = vrot.slane %v2322_v37, %v3528_v15  ;;  %v2249_v26 = vcombine.low %v2193_v38, %v2209_v28  ;;  %v2250_v34 = vcombine.high %v2193_v38, %v2209_v28 }
 0x32a   : > { %v2265_v45 = vcombine.low %v2200_v39, %v2216_v29  ;;  %v2266_v46 = vcombine.high %v2200_v39, %v2216_v29 }
 0x32b   : > { %v2385_v47 = vcombine.low %v2329_v44, %v2345_v42  ;;  %v2386_v48 = vcombine.high %v2329_v44, %v2345_v42  ;;  %v2401_v49 = vcombine.low %v2336_v24, %v2352_v43  ;;  %v2402_v54 = vcombine.high %v2336_v24, %v2352_v43 }
 0x32c   : > { %v2257_v55 = vrot.slane %v2249_v26, %v3538_v25  ;;  %v2264_v57 = vrot.slane %v2250_v34, %v3538_v25  ;;  %v2273_v59 = vrot.slane %v2265_v45, %v3538_v25  ;;  %v2280_v8 = vrot.slane %v2266_v46, %v3538_v25 }
 0x32d   : > { %v2393_v50 = vrot.slane %v2385_v47, %v3538_v25  ;;  %v2400_v51 = vrot.slane %v2386_v48, %v3538_v25  ;;  %v2409_v52 = vrot.slane %v2401_v49, %v3538_v25  ;;  %v2416_v6 = vrot.slane %v2402_v54, %v3538_v25 }
 0x32e   : > { %v2282_v60 = vcombine.high %v3916_v40, %v2257_v55  ;;  %v2283_v61 = vcombine.low %v2232_v62, %v2264_v57  ;;  %v2284_v63 = vcombine.high %v2232_v62, %v2264_v57  ;;  %v2285_v0 = vcombine.low %v2241_v58, %v2273_v59 }
 0x32f   : > { %v2418_v1 = vcombine.high %v3900_v13, %v2393_v50  ;;  %v2419_v2 = vcombine.low %v3903_v18, %v2400_v51  ;;  %v2420_v3 = vcombine.high %v3903_v18, %v2400_v51  ;;  %v2286_v4 = vcombine.high %v2241_v58, %v2273_v59 }
 0x330   : > { %2427 = vrot.lane.b32.xlu0 %v2282_v60, %s4180_s13  ;;  %v2421_v5 = vcombine.low %v3906_v17, %v2409_v52  ;;  %v2422_v9 = vcombine.high %v3906_v17, %v2409_v52  ;;  %v2281_v7 = vcombine.low %v3916_v40, %v2257_v55  ;;  %v2417_v19 = vcombine.low %v3900_v13, %v2393_v50 }
 0x331   : > { %2429 = vrot.lane.b32.xlu1 %v2418_v1, %s4180_s13  ;;  %v2287_v10 = vcombine.low %v2248_v53, %v2280_v8  ;;  %v2288_v11 = vcombine.high %v2248_v53, %v2280_v8  ;;  %v2423_v12 = vcombine.low %v3909_v21, %v2416_v6  ;;  %v2424_v18 = vcombine.high %v3909_v21, %v2416_v6 }
 0x334   : > { %2435 = vrot.lane.b32.xlu0 %v2283_v61, %s4178_s10 }
 0x335   : > { %2437 = vrot.lane.b32.xlu1 %v2419_v2, %s4178_s10 }
 0x338   : > { %2443 = vrot.lane.b32.xlu0 %v2284_v63, %s4175_s15 }
 0x339   : > { %2445 = vrot.lane.b32.xlu1 %v2420_v3, %s4175_s15 }
 0x33c   : > { %2451 = vrot.lane.b32.xlu0 %v2285_v0, %s3393_s6 }
 0x33d   : > { %2453 = vrot.lane.b32.xlu1 %v2421_v5, %s3393_s6 }
 0x340   : > { %2459 = vrot.lane.b32.xlu0 %v2286_v4, %s4173_s17 }
 0x341   : > { %2461 = vrot.lane.b32.xlu1 %v2422_v9, %s4173_s17 }
 0x344   : > { %2467 = vrot.lane.b32.xlu0 %v2287_v10, %s4183_s14 }
 0x345   : > { %2469 = vrot.lane.b32.xlu1 %v2423_v12, %s4183_s14 }
 0x348   : > { %2475 = vrot.lane.b32.xlu0 %v2288_v11, %s4176_s16 }
 0x349   : > { %2477 = vrot.lane.b32.xlu1 %v2424_v18, %s4176_s16 }
 0x3a2   : > { %v2428_v13 = vpop.permute.xlu0 %2427 }
 0x3a3   : > { %v2430_v14 = vpop.permute.xlu1 %2429  ;;  %v2481_v28 = vsel %vm973_vm2, %v2281_v7, %v2428_v13 }
 0x3a4   : > { %v2482_v30 = vsel %vm973_vm2, %v2417_v19, %v2430_v14 }
 0x3a6   : > { %v2436_v16 = vpop.permute.xlu0 %2435 }
 0x3a7   : > { %v2438_v17 = vpop.permute.xlu1 %2437  ;;  %v2483_v29 = vsel %vm977_vm4, %v2481_v28, %v2436_v16 }
 0x3a8   : > { %v2484_v35 = vsel %vm977_vm4, %v2482_v30, %v2438_v17 }
 0x3aa   : > { %v2444_v21 = vpop.permute.xlu0 %2443 }
 0x3ab   : > { %v2446_v31 = vpop.permute.xlu1 %2445  ;;  %v2485_v33 = vsel %vm981_vm6, %v2483_v29, %v2444_v21 }
 0x3ac   : > { %v2486_v38 = vsel %vm981_vm6, %v2484_v35, %v2446_v31 }
 0x3ae   : > { %v2452_v56 = vpop.permute.xlu0 %2451 }
 0x3af   : > { %v2454_v22 = vpop.permute.xlu1 %2453  ;;  %v2487_v37 = vsel %vm985_vm8, %v2485_v33, %v2452_v56 }
 0x3b0   : > { %v2488_v40 = vsel %vm985_vm8, %v2486_v38, %v2454_v22 }
 0x3b2   : > { %v2460_v23 = vpop.permute.xlu0 %2459 }
 0x3b3   : > { %v2462_v27 = vpop.permute.xlu1 %2461  ;;  %v2489_v39 = vsel %vm989_vm10, %v2487_v37, %v2460_v23 }
 0x3b4   : > { %v2490_v42 = vsel %vm989_vm10, %v2488_v40, %v2462_v27 }
 0x3b6   : > { %v2468_v32 = vpop.permute.xlu0 %2467 }
 0x3b7   : > { %v2470_v36 = vpop.permute.xlu1 %2469  ;;  %v2491_v62 = vsel %vm993_vm12, %v2489_v39, %v2468_v32 }
 0x3b8   : > { %v2492_v44 = vsel %vm993_vm12, %v2490_v42, %v2470_v36 }
 0x3ba   : > { %v2476_v43 = vpop.permute.xlu0 %2475 }
 0x3bb   : > { %v2493_v24 = vsel %vm997_vm14, %v2491_v62, %v2476_v43  ;;  %v2478_v26 = vpop.permute.xlu1 %2477 }
 0x3bc   : > { %v2568_v34 = vadd.f32 %v2567_v41, %v2493_v24  ;;  %v2494_v45 = vsel %vm997_vm14, %v2492_v44, %v2478_v26 }
 0x3bd   : > { %v2573_v46 = vadd.f32 %v3157_v20, %v2494_v45 }
 0x3be   : > { %2578 = vrot.lane.b32.xlu0 %v2568_v34, %s4176_s16 }
 0x3bf   : > { %2580 = vrot.lane.b32.xlu1 %v2573_v46, %s4176_s16 }
 0x3c2   : > { %2584 = vrot.lane.b32.xlu0 %v2568_v34, %s4183_s14 }
 0x3c3   : > { %2586 = vrot.lane.b32.xlu1 %v2573_v46, %s4183_s14 }
 0x3c6   : > { %2590 = vrot.lane.b32.xlu0 %v2568_v34, %s4173_s17 }
 0x3c7   : > { %2592 = vrot.lane.b32.xlu1 %v2573_v46, %s4173_s17  ;;  %s3095_s17 = sshll.u32 %s3370_s22, 5 }
 0x3ca   : > { %2596 = vrot.lane.b32.xlu0 %v2568_v34, %s3393_s6 }
 0x3cb   : > { %2598 = vrot.lane.b32.xlu1 %v2573_v46, %s3393_s6  ;;  %s3039_s6 = sshll.u32 %s3735_s30, 7 }
 0x3cc   : > { %s4034_s22 = scalar_lea.vmem [#allocation3], %s3039_s6 }
 0x3ce   : > { %2602 = vrot.lane.b32.xlu0 %v2568_v34, %s4175_s15 }
 0x3cf   : > { %2604 = vrot.lane.b32.xlu1 %v2573_v46, %s4175_s15  ;;  %s4024_s15 = sadd.s32 %s3366_s21, %s3095_s17  ;;  %s2923_s21 = sshll.u32 %s4034_s22, 4  ;;  %s4054_s21 = int_to_ptr.vmem [resolvable:$true] %s2923_s21 }
 0x3d0   : > { %s3096_s16 = sshll.u32 %s4024_s15, 7  ;;  %s3288_s9 = scalar_lea.vmem %s4054_s21, 2048 }
 0x3d1   : > { %s4071_s14 = scalar_lea.hbm %s4147_s5, %s3096_s16  ;;  %p3289_p3 = scmp.ne.s32.totalorder %s4054_s21, %s3288_s9 }
 0x3d2   : > { %2608 = vrot.lane.b32.xlu0 %v2568_v34, %s4178_s10  ;;  %s3292_s17 = sshll.u32 %s3403_s11, 4  ;;  %s3293_s17 = int_to_ptr.vmem [resolvable:$false] %s3292_s17 }
 0x3d3   : > { %2610 = vrot.lane.b32.xlu1 %v2573_v46, %s4178_s10  ;;  %p3290_p4 = pnand %p3289_p3, %p3496_p8  ;;  %s3294_s6 = scalar_lea.vmem %s3293_s17, 4096 }
 0x3d4   : > { %p3295_p6 = scmp.lt.s32.totalorder %s4054_s21, %s3293_s17  ;;  %p3296_p7 = scmp.lt.s32.totalorder %s3294_s6, %s3288_s9 }
 0x3d5   : > { %p3291_p5 = pneg %p3290_p4 }
 0x3d6   : > { %2614 = vrot.lane.b32.xlu0 %v2568_v34, %s4180_s13  ;;  %p3297_p10 = por %p3296_p7, %p3295_p6 }
 0x3d7   : > { %2616 = vrot.lane.b32.xlu1 %v2573_v46, %s4180_s13 }
 0x3d8   : > { %p3298_p11 = pnand %p3297_p10, %p3291_p5 }
 0x430   : > { %v2579_v47 = vpop.permute.xlu0 %2578 }
 0x431   : > { %v2581_v48 = vpop.permute.xlu1 %2580 }
 0x434   : > { %v2585_v49 = vpop.permute.xlu0 %2584 }
 0x435   : > { %v2587_v54 = vpop.permute.xlu1 %2586  ;;  %v2620_v51 = vcombine.low %v2568_v34, %v2585_v49  ;;  %v2621_v60 = vcombine.high %v2568_v34, %v2585_v49 }
 0x436   : > { %v2756_v63 = vcombine.low %v2573_v46, %v2587_v54  ;;  %v2757_v1 = vcombine.high %v2573_v46, %v2587_v54 }
 0x437   : > { %v2628_v4 = vrot.slane %v2620_v51, %v3528_v15  ;;  %v2635_v9 = vrot.slane %v2621_v60, %v3528_v15 }
 0x438   : > { %v2591_v55 = vpop.permute.xlu0 %2590  ;;  %v2764_v7 = vrot.slane %v2756_v63, %v3528_v15  ;;  %v2771_v11 = vrot.slane %v2757_v1, %v3528_v15 }
 0x439   : > { %v2593_v57 = vpop.permute.xlu1 %2592  ;;  %v2636_v58 = vcombine.low %v2579_v47, %v2591_v55  ;;  %v2637_v59 = vcombine.high %v2579_v47, %v2591_v55 }
 0x43a   : > { %v2772_v52 = vcombine.low %v2581_v48, %v2593_v57  ;;  %v2773_v61 = vcombine.high %v2581_v48, %v2593_v57 }
 0x43b   : > { %v2644_v0 = vrot.slane %v2636_v58, %v3528_v15  ;;  %v2651_v2 = vrot.slane %v2637_v59, %v3528_v15 }
 0x43c   : > { %v2597_v50 = vpop.permute.xlu0 %2596  ;;  %v2780_v5 = vrot.slane %v2772_v52, %v3528_v15  ;;  %v2787_v6 = vrot.slane %v2773_v61, %v3528_v15 }
 0x43d   : > { %v2599_v53 = vpop.permute.xlu1 %2598  ;;  %v2684_v19 = vcombine.low %v2628_v4, %v2644_v0  ;;  %v2685_v10 = vcombine.high %v2628_v4, %v2644_v0  ;;  %v2700_v12 = vcombine.low %v2635_v9, %v2651_v2  ;;  %v2701_v18 = vcombine.high %v2635_v9, %v2651_v2 }
 0x43e   : > { %v2820_v41 = vcombine.low %v2764_v7, %v2780_v5  ;;  %v2821_v13 = vcombine.high %v2764_v7, %v2780_v5  ;;  %v2836_v16 = vcombine.low %v2771_v11, %v2787_v6  ;;  %v2837_v17 = vcombine.high %v2771_v11, %v2787_v6 }
 0x43f   : > { %v2692_v21 = vrot.slane %v2684_v19, %v3538_v25  ;;  %v2699_v31 = vrot.slane %v2685_v10, %v3538_v25  ;;  %v3996_v23 = vrot.slane %v2700_v12, %v3538_v25  ;;  %v3999_v27 = vrot.slane %v2701_v18, %v3538_v25 }
 0x440   : > { %v2603_v3 = vpop.permute.xlu0 %2602  ;;  %v4002_v32 = vrot.slane %v2820_v41, %v3538_v25  ;;  %v4005_v33 = vrot.slane %v2821_v13, %v3538_v25  ;;  %v4008_v38 = vrot.slane %v2836_v16, %v3538_v25  ;;  %v4011_v39 = vrot.slane %v2837_v17, %v3538_v25 }
 0x441   : > { %v2605_v8 = vpop.permute.xlu1 %2604 }
 0x444   : > { %v2609_v20 = vpop.permute.xlu0 %2608 }
 0x445   : > { %v2611_v14 = vpop.permute.xlu1 %2610  ;;  %v2652_v56 = vcombine.low %v2597_v50, %v2609_v20  ;;  %v2653_v22 = vcombine.high %v2597_v50, %v2609_v20 }
 0x446   : > { %v2788_v28 = vcombine.low %v2599_v53, %v2611_v14  ;;  %v2789_v29 = vcombine.high %v2599_v53, %v2611_v14 }
 0x447   : > { %v2660_v42 = vrot.slane %v2652_v56, %v3528_v15  ;;  %v2667_v43 = vrot.slane %v2653_v22, %v3528_v15 }
 0x448   : > { %v2615_v30 = vpop.permute.xlu0 %2614  ;;  %v2796_v26 = vrot.slane %v2788_v28, %v3528_v15  ;;  %v2803_v34 = vrot.slane %v2789_v29, %v3528_v15 }
 0x449   : > { %v2668_v35 = vcombine.low %v2603_v3, %v2615_v30  ;;  %v2669_v36 = vcombine.high %v2603_v3, %v2615_v30  ;;  %v2617_v37 = vpop.permute.xlu1 %2616 }
 0x44a   : > { %v2804_v40 = vcombine.low %v2605_v8, %v2617_v37  ;;  %v2805_v62 = vcombine.high %v2605_v8, %v2617_v37 }
 0x44b   : > { %v2676_v44 = vrot.slane %v2668_v35, %v3528_v15  ;;  %v2683_v24 = vrot.slane %v2669_v36, %v3528_v15 }
 0x44c   : > { %v2812_v45 = vrot.slane %v2804_v40, %v3528_v15  ;;  %v2819_v46 = vrot.slane %v2805_v62, %v3528_v15 }
 0x44d   : > { %v2716_v47 = vcombine.low %v2660_v42, %v2676_v44  ;;  %v2717_v48 = vcombine.high %v2660_v42, %v2676_v44  ;;  %v2732_v49 = vcombine.low %v2667_v43, %v2683_v24  ;;  %v2733_v54 = vcombine.high %v2667_v43, %v2683_v24 }
 0x44e   : > { %v2852_v55 = vcombine.low %v2796_v26, %v2812_v45  ;;  %v2853_v57 = vcombine.high %v2796_v26, %v2812_v45  ;;  %v2868_v58 = vcombine.low %v2803_v34, %v2819_v46  ;;  %v2869_v59 = vcombine.high %v2803_v34, %v2819_v46 }
 0x44f   : > { %v2724_v50 = vrot.slane %v2716_v47, %v3538_v25  ;;  %v2731_v51 = vrot.slane %v2717_v48, %v3538_v25  ;;  %v2740_v52 = vrot.slane %v2732_v49, %v3538_v25  ;;  %v2747_v53 = vrot.slane %v2733_v54, %v3538_v25 }
 0x450   : > { %v2860_v15 = vrot.slane %v2852_v55, %v3538_v25  ;;  %v2867_v60 = vrot.slane %v2853_v57, %v3538_v25  ;;  %v2876_v61 = vrot.slane %v2868_v58, %v3538_v25  ;;  %v2883_v63 = vrot.slane %v2869_v59, %v3538_v25 }
 0x451   : > { %v2748_v0 = vcombine.low %v2692_v21, %v2724_v50  ;;  %v2749_v1 = vcombine.high %v2692_v21, %v2724_v50  ;;  %v2750_v2 = vcombine.low %v2699_v31, %v2731_v51  ;;  %v2751_v3 = vcombine.high %v2699_v31, %v2731_v51 }
 0x452   : > { %v2752_v4 = vcombine.low %v3996_v23, %v2740_v52  ;;  %v2753_v25 = vcombine.high %v3996_v23, %v2740_v52  ;;  %v2754_v5 = vcombine.low %v3999_v27, %v2747_v53  ;;  %v2755_v8 = vcombine.high %v3999_v27, %v2747_v53 }
 0x453   : > { %2892 = vst.msk [vmem:[%s4034_s22] sm:$0xff] %vm973_vm2, %v2748_v0  ;;  %2893 = vst.msk [vmem:[%s4034_s22 + $0x8] sm:$0xff] %vm973_vm2, %v2749_v1  ;;  %v2884_v9 = vcombine.low %v4002_v32, %v2860_v15  ;;  %v2885_v6 = vcombine.high %v4002_v32, %v2860_v15  ;;  %v2886_v7 = vcombine.low %v4005_v33, %v2867_v60 }
 0x454   : > { %2894 = vst.msk [vmem:[%s4034_s22 + $0x10] sm:$0xff] %vm973_vm2, %v2750_v2  ;;  %2895 = vst.msk [vmem:[%s4034_s22 + $0x18] sm:$0xff] %vm973_vm2, %v2751_v3  ;;  %v2887_v19 = vcombine.high %v4005_v33, %v2867_v60  ;;  %v2888_v10 = vcombine.low %v4008_v38, %v2876_v61  ;;  %v2889_v11 = vcombine.high %v4008_v38, %v2876_v61 }
 0x455   : > { %2896 = vst.msk [vmem:[%s4034_s22 + $0x20] sm:$0xff] %vm973_vm2, %v2752_v4  ;;  %2897 = vst.msk [vmem:[%s4034_s22 + $0x28] sm:$0xff] %vm973_vm2, %v2753_v25  ;;  %v2890_v12 = vcombine.low %v4011_v39, %v2883_v63  ;;  %v2891_v18 = vcombine.high %v4011_v39, %v2883_v63 }
 0x456   : > { %2898 = vst.msk [vmem:[%s4034_s22 + $0x30] sm:$0xff] %vm973_vm2, %v2754_v5  ;;  %2899 = vst.msk [vmem:[%s4034_s22 + $0x38] sm:$0xff] %vm973_vm2, %v2755_v8 }
 0x457   : > { %2900 = vst.msk [vmem:[%s4034_s22 + $0x40] sm:$0xff] %vm973_vm2, %v2884_v9  ;;  %2901 = vst.msk [vmem:[%s4034_s22 + $0x48] sm:$0xff] %vm973_vm2, %v2885_v6 }
 0x458   : > { %2902 = vst.msk [vmem:[%s4034_s22 + $0x50] sm:$0xff] %vm973_vm2, %v2886_v7  ;;  %2903 = vst.msk [vmem:[%s4034_s22 + $0x58] sm:$0xff] %vm973_vm2, %v2887_v19 }
 0x459   : > { %2904 = vst.msk [vmem:[%s4034_s22 + $0x60] sm:$0xff] %vm973_vm2, %v2888_v10  ;;  %2905 = vst.msk [vmem:[%s4034_s22 + $0x68] sm:$0xff] %vm973_vm2, %v2889_v11 }
 0x45a   : > { %2906 = vst.msk [vmem:[%s4034_s22 + $0x70] sm:$0xff] %vm973_vm2, %v2890_v12  ;;  %2907 = vst.msk [vmem:[%s4034_s22 + $0x78] sm:$0xff] %vm973_vm2, %v2891_v18 }
 0x45b   : > { %3301 = shalt.err (!%p3298_p11)
}
 0x45c   : > { %s3302_s15 = scalar_lea.hbm %s4071_s14, 2048  ;;  %s3306_s10 = scalar_lea.hbm %s4147_s5, 8192 }
 0x45d   : > { %p3303_p12 = scmp.ne.s32.totalorder %s4071_s14, %s3302_s15  ;;  %p3307_p1 = scmp.lt.u32.totalorder %s4071_s14, %s4147_s5 }
 0x45e   : > { %p3308_p2 = scmp.lt.u32.totalorder %s3306_s10, %s3302_s15  ;;  %p3310_p4 = scmp.lt.u32.totalorder %s3302_s15, %s4071_s14 }
 0x45f   : > { %p3304_p13 = pnand %p3303_p12, %p3496_p8 }
 0x460   : > { %p3309_p3 = por %p3308_p2, %p3307_p1 }
 0x461   : > { %p3305_p0 = pneg %p3304_p13 }
 0x462   : > { %p3311_p5 = por %p3310_p4, %p3309_p3 }
 0x464   : > { %p3312_p6 = pnand %p3311_p5, %p3305_p0 }
 0x466   : > { %3315 = shalt.err (!%p3312_p6)
}
 0x467   : > { %s3404_s9 = smov 128   ;;  %s3405_s17 = smov 256  }
 0x468   : > { %3160 = dma.vmem_to_hbm [thread:$0]  (%p3496_p8), %s4054_s21, 2048, %s4071_s14, %s2909_s26, %s3404_s9, %s3405_s17, %s4182_s27  }
 0x469 PF: > { %p3166_p7 = scmp.ge.s32.totalorder %s3382_s25, 2  ;;  %s2938_s6 = sand.u32 1, %s3354_s18  }
 0x46a   : > { %s2939_s15 = scalar_lea.sflag [#allocation4], %s2938_s6 }
 0x46b   : > { %p3163_p10 = pnand %p3166_p7, %p3500_p9 }
 0x46d   : > { %3349 = dma.done.wait (!%p3163_p10), %s2939_s15, 2048  }
 0x46e   : > { %3351 = vsyncadd (!%p3163_p10), %s2939_s15, 4294965248  ;;  %s18_s25 = sadd.s32 1, %s3382_s25   ;;  %s4184_s18 = smov %s3358_s19 }
 0x46f   : > { %p15_p11 = scmp.ge.s32.totalorder %s18_s25, 6   ;;  %s4185_s19 = smov %s3362_s20 }
 0x470   : > { %s4186_s20 = smov %s3508_s12  ;;  %s4187_s21 = smov %s3374_s23 }
 0x471   : > { %s4188_s22 = smov %s3378_s24  ;;  %s4189_s23 = smov %s4192_s28 }
 0x472   : > { %s4190_s24 = smov %s4196_s29  ;;  %17 = sbr.rel (!%p15_p11) target bundleno = 5 (0x5), region = 124 }
 0x479   :  { %2944 = vsyncpa [#allocation4], 1 }
 0x47a   :  { %2946 = vsyncpa [#allocation4 + $0x1], 1 }

</bundles_post_ra>
